<compile_context>
chip_gen: v7x
topology: tpu7x:2x2x1
jax: 0.10.0
libtpu: 0.0.40
codegen_flags: <defaults>
</compile_context>

<pallas_src>
import jax
import jax.numpy as jnp
import numpy as np
from jax import lax
from jax.experimental import pallas as pl
from jax.experimental.pallas import tpu as pltpu


def _round_up(x, m):
    return (x + m - 1) // m * m


# PyTorch LSTM gate row order is (i, f, g, o); the fused kernel layout is
# (i, f, o, g) so one sigmoid covers gates[:, :3G] and one tanh the rest.
_GATE_ORDER = (0, 1, 3, 2)


def _bilstm_kernel(gates_in_ref, whh_ref, out_ref):
    """Fused bidirectional LSTM recurrence for one batch tile.

    gates_in_ref: (T, TB, 4*G) f32. Precomputed x @ W_ih + (b_ih + b_hh) for
                  both directions; gate k (order i,f,o,g) occupies columns
                  [k*G, (k+1)*G) = [forward Hp | backward Hp], the backward
                  direction's time axis already reversed (processing order).
    whh_ref:      (G, 4*G) f32 block-diagonal fused recurrent weights.
    out_ref:      (T, TB, G) f32 hidden states in processing order:
                  out[t] = [h_f(t) | h_b(original time T-1-t)].
    """
    T, TB, G4 = gates_in_ref.shape
    G = G4 // 4
    f32 = jnp.float32

    def step(t, carry):
        h, c = carry                       # register-carried state: no VMEM
                                           # round-trip on the serial path.
        # whh streamed from VMEM at the call site (never pinned in vregs).
        gates = gates_in_ref[t] + jnp.dot(
            h, whh_ref[...], preferred_element_type=f32)
        act = jax.nn.sigmoid(gates[:, : 3 * G])   # i | f | o in one EUP stream
        i = act[:, 0 * G: 1 * G]
        f = act[:, 1 * G: 2 * G]
        o = act[:, 2 * G: 3 * G]
        g = jnp.tanh(gates[:, 3 * G:])
        c = f * c + i * g
        h = o * jnp.tanh(c)
        out_ref[t] = h                     # full-lane-width (TB, G) store
        return (h, c)

    # T is static and small: full unroll removes loop overhead. Cross-step
    # overlap is limited by the h(t) dependency; the batch-tile width (TB
    # independent rows) is what keeps the MXU/VPU/EUP busy within each step.
    # TODO(synk): weight-stationary MXU driving (pltpu.matmul_push_rhs once
    # before the loop, matmul_acc_lhs/matmul_pop per step) if the bundle dump
    # shows the loop-invariant RHS being re-pushed every timestep.
    h0 = jnp.zeros((TB, G), f32)
    c0 = jnp.zeros((TB, G), f32)
    lax.fori_loop(0, T, step, (h0, c0), unroll=True)


def prepare_params(params):
    """Build fused / padded / gate-reordered weights ONCE (param-prep time).

    Returns (dict of fused jnp arrays, (H, Hp)).
    Padded rows/cols are exactly zero so padded lanes provably stay zero
    through the recurrence (sigmoid(0)*0 terms).
    """
    H = params["w_hh_f"].shape[1]
    D = params["w_ih_f"].shape[1]
    Hp = _round_up(H, 64)          # per-direction padded size; G = 2*Hp is a
    G = 2 * Hp                     # multiple of 128 lanes.

    w_ih = np.zeros((D, 4 * G), np.float32)
    bias = np.zeros((4 * G,), np.float32)
    w_hh = np.zeros((G, 4 * G), np.float32)

    def n(a):
        return np.asarray(a, np.float32)

    for new_k, old_k in enumerate(_GATE_ORDER):
        rows = slice(old_k * H, (old_k + 1) * H)
        cf = new_k * G            # forward columns within gate group new_k
        cb = cf + Hp              # backward columns within gate group new_k
        w_ih[:, cf:cf + H] = n(params["w_ih_f"])[rows].T
        w_ih[:, cb:cb + H] = n(params["w_ih_b"])[rows].T
        bias[cf:cf + H] = n(params["b_ih_f"])[rows] + n(params["b_hh_f"])[rows]
        bias[cb:cb + H] = n(params["b_ih_b"])[rows] + n(params["b_hh_b"])[rows]
        w_hh[0:H, cf:cf + H] = n(params["w_hh_f"])[rows].T
        w_hh[Hp:Hp + H, cb:cb + H] = n(params["w_hh_b"])[rows].T

    fused = {"w_ih": jnp.asarray(w_ih),
             "bias": jnp.asarray(bias),
             "w_hh": jnp.asarray(w_hh)}
    return fused, (H, Hp)


def short_sequence_forward(x, fused, dims, dropout_rate=0.5):
    """x: (B, T, D) batch_first, like the PyTorch module. Returns (B, T, 2H)."""
    del dropout_rate  # nn.Dropout is identity in eval mode.
    B, T, D = x.shape
    H, Hp = dims
    G = 2 * Hp
    f32 = jnp.float32

    # Full (8,128) sublane tiles; larger tiles give the MXU/VPU more
    # independent rows per (strictly serial) timestep.
    TB = min(_round_up(B, 8), 16)
    Bp = _round_up(B, TB)

    x_p = jnp.zeros((Bp, T, D), f32).at[:B].set(x.astype(f32))
    x_tm = jnp.transpose(x_p, (1, 0, 2)).reshape(T * Bp, D)

    # One fused input projection for both directions, biases folded in.
    # TODO(synk): store gates_in in bf16 on v6e/v7x (halves DMA & VMEM; needs
    # the 1e-4 self-check relaxed); keep elementwise math f32 on v5e.
    g = (x_tm @ fused["w_ih"] + fused["bias"]).reshape(T, Bp, 4, G)
    # Processing order: forward gates at time t, backward gates at T-1-t.
    gates_in = jnp.concatenate([g[..., :Hp], g[::-1, :, :, Hp:]], axis=-1)
    gates_in = gates_in.reshape(T, Bp, 4 * G)

    n_tiles = Bp // TB
    vmem_limit = int(min(max(
        8 * (T * TB * 5 * G + G * 4 * G) + (4 << 20), 16 << 20), 32 << 20))
    # TODO(synk): for production SeqSleepNet shapes on v7x, additionally chunk
    # the T axis (grid over T, h/c carried in scratch across an "arbitrary"
    # axis) instead of keeping the whole per-tile gates_in/out slabs resident.

    slab = pl.pallas_call(
        _bilstm_kernel,
        out_shape=jax.ShapeDtypeStruct((T, Bp, G), f32),
        grid_spec=pltpu.PrefetchScalarGridSpec(
            num_scalar_prefetch=0,
            grid=(n_tiles,),
            in_specs=[
                pl.BlockSpec((T, TB, 4 * G), lambda b: (0, b, 0)),
                pl.BlockSpec((G, 4 * G), lambda b: (0, 0)),     # broadcast
            ],
            out_specs=pl.BlockSpec((T, TB, G), lambda b: (0, b, 0)),
        ),
        compiler_params=pltpu.CompilerParams(
            dimension_semantics=("parallel",),   # independent batch tiles
            vmem_limit_bytes=vmem_limit),
    )(gates_in, fused["w_hh"])

    out_f = slab[:, :B, 0:H]               # (T, B, H) forward, time-major
    out_b = slab[::-1, :B, Hp:Hp + H]      # un-reverse backward direction
    out = jnp.transpose(jnp.concatenate([out_f, out_b], axis=-1), (1, 0, 2))

    # TODO(synk): training-mode dropout (scaled Bernoulli mask via
    # pltpu.prng_seed / pltpu.stateful_bernoulli) if train semantics needed.
    return out


def init_params(key, input_size, hidden_size):
    """Deterministic PyTorch-style init: U(-1/sqrt(H), 1/sqrt(H))."""
    k = 1.0 / np.sqrt(hidden_size)
    names_shapes = [
        ("w_ih_f", (4 * hidden_size, input_size)),
        ("w_hh_f", (4 * hidden_size, hidden_size)),
        ("b_ih_f", (4 * hidden_size,)),
        ("b_hh_f", (4 * hidden_size,)),
        ("w_ih_b", (4 * hidden_size, input_size)),
        ("w_hh_b", (4 * hidden_size, hidden_size)),
        ("b_ih_b", (4 * hidden_size,)),
        ("b_hh_b", (4 * hidden_size,)),
    ]
    params = {}
    for name, shape in names_shapes:
        key, sub = jax.random.split(key)
        params[name] = jax.random.uniform(sub, shape, jnp.float32, -k, k)
    return params, key


def reference_forward(x, params):
    """Pure-JAX bidirectional LSTM reference (PyTorch semantics, eval mode)."""
    B, T, D = x.shape
    H = params["w_hh_f"].shape[1]

    def run_dir(x_seq, wih, whh, bih, bhh):
        h = jnp.zeros((B, H), jnp.float32)
        c = jnp.zeros((B, H), jnp.float32)
        outs = []
        for t in range(x_seq.shape[1]):
            g = x_seq[:, t] @ wih.T + h @ whh.T + bih + bhh
            i = jax.nn.sigmoid(g[:, :H])
            f = jax.nn.sigmoid(g[:, H:2 * H])
            gg = jnp.tanh(g[:, 2 * H:3 * H])
            o = jax.nn.sigmoid(g[:, 3 * H:])
            c = f * c + i * gg
            h = o * jnp.tanh(c)
            outs.append(h)
        return jnp.stack(outs, axis=1)

    fwd = run_dir(x, params["w_ih_f"], params["w_hh_f"],
                  params["b_ih_f"], params["b_hh_f"])
    bwd = run_dir(x[:, ::-1], params["w_ih_b"], params["w_hh_b"],
                  params["b_ih_b"], params["b_hh_b"])[:, ::-1]
    return jnp.concatenate([fwd, bwd], axis=-1)


if __name__ == "__main__":
    B, T, D, H = 2, 8, 16, 32   # batch, seq, lstm_input_size, lstm_hidden_size

    key = jax.random.PRNGKey(0)
    params, key = init_params(key, D, H)
    fused, dims = prepare_params(params)      # one-time fused weight prep

    key, kx = jax.random.split(key)
    x = jax.random.normal(kx, (B, T, D), dtype=jnp.float32)

    fwd = jax.jit(short_sequence_forward, static_argnums=(2,))
    out = jax.block_until_ready(fwd(x, fused, dims))
    assert out.shape == (B, T, 2 * H), out.shape

    ref = reference_forward(x, params)
    np.testing.assert_allclose(np.asarray(out), np.asarray(ref),
                               rtol=1e-4, atol=1e-4)
    print("KERNEL_OK")
</pallas_src>

<mosaic_0001>
module attributes {stable_mosaic.version = 11 : i64} {
  func.func @_bilstm_kernel(%arg0: i32, %arg1: memref<8x8x512xf32, #tpu.memory_space<vmem>>, %arg2: memref<128x512xf32, #tpu.memory_space<vmem>>, %arg3: memref<8x8x128xf32, #tpu.memory_space<vmem>>) attributes {dimension_semantics = [#tpu.dimension_semantics<parallel>], iteration_bounds = array<i64: 1>, scalar_prefetch = 0 : i64, scratch_operands = 0 : i64, tpu.core_type = #tpu.core_type<tc>, window_params = [{transform_indices = @transform_0, window_bounds = array<i64: 8, 8, 512>}, {pipeline_mode = #tpu.pipeline_mode<synchronous>, transform_indices = @transform_1, window_bounds = array<i64: 128, 512>}, {transform_indices = @transform_2, window_bounds = array<i64: 8, 8, 128>}]} {
    %cst = arith.constant 0.000000e+00 : f32
    %0 = vector.broadcast %cst : f32 to vector<8x128xf32>
    %cst_0 = arith.constant 0.000000e+00 : f32
    %1 = vector.broadcast %cst_0 : f32 to vector<8x128xf32>
    %c0_i32 = arith.constant 0 : i32
    %2 = arith.index_cast %c0_i32 : i32 to index
    %c0 = arith.constant 0 : index
    %c0_1 = arith.constant 0 : index
    %3 = vector.load %arg1[%2, %c0, %c0_1] : memref<8x8x512xf32, #tpu.memory_space<vmem>>, vector<1x8x512xf32>
    %4 = vector.shape_cast %3 : vector<1x8x512xf32> to vector<8x512xf32>
    %c0_2 = arith.constant 0 : index
    %c0_3 = arith.constant 0 : index
    %5 = vector.load %arg2[%c0_2, %c0_3] : memref<128x512xf32, #tpu.memory_space<vmem>>, vector<128x512xf32>
    %cst_4 = arith.constant dense<0.000000e+00> : vector<8x512xf32>
    %6 = tpu.matmul %0, %5, %cst_4 {dimension_numbers = #tpu.dot_dimension_numbers<[1], [0], [0], [1], [0, 0, 1, 1], [], []>} : vector<8x128xf32>, vector<128x512xf32>, vector<8x512xf32> -> vector<8x512xf32>
    %7 = arith.addf %4, %6 : vector<8x512xf32>
    %8 = vector.extract_strided_slice %7 {offsets = [0, 0], sizes = [8, 384], strides = [1, 1]} : vector<8x512xf32> to vector<8x384xf32>
    %9 = arith.negf %8 : vector<8x384xf32>
    %10 = math.exp %9 : vector<8x384xf32>
    %cst_5 = arith.constant 1.000000e+00 : f32
    %11 = vector.broadcast %cst_5 : f32 to vector<8x384xf32>
    %12 = arith.addf %11, %10 : vector<8x384xf32>
    %13 = arith.divf %11, %12 : vector<8x384xf32>
    %14 = vector.extract_strided_slice %13 {offsets = [0, 0], sizes = [8, 128], strides = [1, 1]} : vector<8x384xf32> to vector<8x128xf32>
    %15 = vector.extract_strided_slice %13 {offsets = [0, 128], sizes = [8, 128], strides = [1, 1]} : vector<8x384xf32> to vector<8x128xf32>
    %16 = vector.extract_strided_slice %13 {offsets = [0, 256], sizes = [8, 128], strides = [1, 1]} : vector<8x384xf32> to vector<8x128xf32>
    %17 = vector.extract_strided_slice %7 {offsets = [0, 384], sizes = [8, 128], strides = [1, 1]} : vector<8x512xf32> to vector<8x128xf32>
    %18 = math.tanh %17 : vector<8x128xf32>
    %19 = arith.mulf %15, %1 : vector<8x128xf32>
    %20 = arith.mulf %14, %18 : vector<8x128xf32>
    %21 = arith.addf %19, %20 : vector<8x128xf32>
    %22 = math.tanh %21 : vector<8x128xf32>
    %23 = arith.mulf %16, %22 : vector<8x128xf32>
    %24 = arith.index_cast %c0_i32 : i32 to index
    %c0_6 = arith.constant 0 : index
    %c0_7 = arith.constant 0 : index
    %25 = vector.load %arg3[%24, %c0_6, %c0_7] : memref<8x8x128xf32, #tpu.memory_space<vmem>>, vector<1x8x128xf32>
    %26 = vector.shape_cast %25 : vector<1x8x128xf32> to vector<8x128xf32>
    %27 = vector.shape_cast %23 : vector<8x128xf32> to vector<1x8x128xf32>
    tpu.vector_store %arg3[%24, %c0_6, %c0_7], %27 {strides = array<i32>} : memref<8x8x128xf32, #tpu.memory_space<vmem>>, vector<1x8x128xf32>,
    %c1_i32 = arith.constant 1 : i32
    %28 = arith.index_cast %c1_i32 : i32 to index
    %c0_8 = arith.constant 0 : index
    %c0_9 = arith.constant 0 : index
    %29 = vector.load %arg1[%28, %c0_8, %c0_9] : memref<8x8x512xf32, #tpu.memory_space<vmem>>, vector<1x8x512xf32>
    %30 = vector.shape_cast %29 : vector<1x8x512xf32> to vector<8x512xf32>
    %c0_10 = arith.constant 0 : index
    %c0_11 = arith.constant 0 : index
    %31 = vector.load %arg2[%c0_10, %c0_11] : memref<128x512xf32, #tpu.memory_space<vmem>>, vector<128x512xf32>
    %cst_12 = arith.constant dense<0.000000e+00> : vector<8x512xf32>
    %32 = tpu.matmul %23, %31, %cst_12 {dimension_numbers = #tpu.dot_dimension_numbers<[1], [0], [0], [1], [0, 0, 1, 1], [], []>} : vector<8x128xf32>, vector<128x512xf32>, vector<8x512xf32> -> vector<8x512xf32>
    %33 = arith.addf %30, %32 : vector<8x512xf32>
    %34 = vector.extract_strided_slice %33 {offsets = [0, 0], sizes = [8, 384], strides = [1, 1]} : vector<8x512xf32> to vector<8x384xf32>
    %35 = arith.negf %34 : vector<8x384xf32>
    %36 = math.exp %35 : vector<8x384xf32>
    %cst_13 = arith.constant 1.000000e+00 : f32
    %37 = vector.broadcast %cst_13 : f32 to vector<8x384xf32>
    %38 = arith.addf %37, %36 : vector<8x384xf32>
    %39 = arith.divf %37, %38 : vector<8x384xf32>
    %40 = vector.extract_strided_slice %39 {offsets = [0, 0], sizes = [8, 128], strides = [1, 1]} : vector<8x384xf32> to vector<8x128xf32>
    %41 = vector.extract_strided_slice %39 {offsets = [0, 128], sizes = [8, 128], strides = [1, 1]} : vector<8x384xf32> to vector<8x128xf32>
    %42 = vector.extract_strided_slice %39 {offsets = [0, 256], sizes = [8, 128], strides = [1, 1]} : vector<8x384xf32> to vector<8x128xf32>
    %43 = vector.extract_strided_slice %33 {offsets = [0, 384], sizes = [8, 128], strides = [1, 1]} : vector<8x512xf32> to vector<8x128xf32>
    %44 = math.tanh %43 : vector<8x128xf32>
    %45 = arith.mulf %41, %21 : vector<8x128xf32>
    %46 = arith.mulf %40, %44 : vector<8x128xf32>
    %47 = arith.addf %45, %46 : vector<8x128xf32>
    %48 = math.tanh %47 : vector<8x128xf32>
    %49 = arith.mulf %42, %48 : vector<8x128xf32>
    %50 = arith.index_cast %c1_i32 : i32 to index
    %c0_14 = arith.constant 0 : index
    %c0_15 = arith.constant 0 : index
    %51 = vector.load %arg3[%50, %c0_14, %c0_15] : memref<8x8x128xf32, #tpu.memory_space<vmem>>, vector<1x8x128xf32>
    %52 = vector.shape_cast %51 : vector<1x8x128xf32> to vector<8x128xf32>
    %53 = vector.shape_cast %49 : vector<8x128xf32> to vector<1x8x128xf32>
    tpu.vector_store %arg3[%50, %c0_14, %c0_15], %53 {strides = array<i32>} : memref<8x8x128xf32, #tpu.memory_space<vmem>>, vector<1x8x128xf32>,
    %c2_i32 = arith.constant 2 : i32
    %54 = arith.index_cast %c2_i32 : i32 to index
    %c0_16 = arith.constant 0 : index
    %c0_17 = arith.constant 0 : index
    %55 = vector.load %arg1[%54, %c0_16, %c0_17] : memref<8x8x512xf32, #tpu.memory_space<vmem>>, vector<1x8x512xf32>
    %56 = vector.shape_cast %55 : vector<1x8x512xf32> to vector<8x512xf32>
    %c0_18 = arith.constant 0 : index
    %c0_19 = arith.constant 0 : index
    %57 = vector.load %arg2[%c0_18, %c0_19] : memref<128x512xf32, #tpu.memory_space<vmem>>, vector<128x512xf32>
    %cst_20 = arith.constant dense<0.000000e+00> : vector<8x512xf32>
    %58 = tpu.matmul %49, %57, %cst_20 {dimension_numbers = #tpu.dot_dimension_numbers<[1], [0], [0], [1], [0, 0, 1, 1], [], []>} : vector<8x128xf32>, vector<128x512xf32>, vector<8x512xf32> -> vector<8x512xf32>
    %59 = arith.addf %56, %58 : vector<8x512xf32>
    %60 = vector.extract_strided_slice %59 {offsets = [0, 0], sizes = [8, 384], strides = [1, 1]} : vector<8x512xf32> to vector<8x384xf32>
    %61 = arith.negf %60 : vector<8x384xf32>
    %62 = math.exp %61 : vector<8x384xf32>
    %cst_21 = arith.constant 1.000000e+00 : f32
    %63 = vector.broadcast %cst_21 : f32 to vector<8x384xf32>
    %64 = arith.addf %63, %62 : vector<8x384xf32>
    %65 = arith.divf %63, %64 : vector<8x384xf32>
    %66 = vector.extract_strided_slice %65 {offsets = [0, 0], sizes = [8, 128], strides = [1, 1]} : vector<8x384xf32> to vector<8x128xf32>
    %67 = vector.extract_strided_slice %65 {offsets = [0, 128], sizes = [8, 128], strides = [1, 1]} : vector<8x384xf32> to vector<8x128xf32>
    %68 = vector.extract_strided_slice %65 {offsets = [0, 256], sizes = [8, 128], strides = [1, 1]} : vector<8x384xf32> to vector<8x128xf32>
    %69 = vector.extract_strided_slice %59 {offsets = [0, 384], sizes = [8, 128], strides = [1, 1]} : vector<8x512xf32> to vector<8x128xf32>
    %70 = math.tanh %69 : vector<8x128xf32>
    %71 = arith.mulf %67, %47 : vector<8x128xf32>
    %72 = arith.mulf %66, %70 : vector<8x128xf32>
    %73 = arith.addf %71, %72 : vector<8x128xf32>
    %74 = math.tanh %73 : vector<8x128xf32>
    %75 = arith.mulf %68, %74 : vector<8x128xf32>
    %76 = arith.index_cast %c2_i32 : i32 to index
    %c0_22 = arith.constant 0 : index
    %c0_23 = arith.constant 0 : index
    %77 = vector.load %arg3[%76, %c0_22, %c0_23] : memref<8x8x128xf32, #tpu.memory_space<vmem>>, vector<1x8x128xf32>
    %78 = vector.shape_cast %77 : vector<1x8x128xf32> to vector<8x128xf32>
    %79 = vector.shape_cast %75 : vector<8x128xf32> to vector<1x8x128xf32>
    tpu.vector_store %arg3[%76, %c0_22, %c0_23], %79 {strides = array<i32>} : memref<8x8x128xf32, #tpu.memory_space<vmem>>, vector<1x8x128xf32>,
    %c3_i32 = arith.constant 3 : i32
    %80 = arith.index_cast %c3_i32 : i32 to index
    %c0_24 = arith.constant 0 : index
    %c0_25 = arith.constant 0 : index
    %81 = vector.load %arg1[%80, %c0_24, %c0_25] : memref<8x8x512xf32, #tpu.memory_space<vmem>>, vector<1x8x512xf32>
    %82 = vector.shape_cast %81 : vector<1x8x512xf32> to vector<8x512xf32>
    %c0_26 = arith.constant 0 : index
    %c0_27 = arith.constant 0 : index
    %83 = vector.load %arg2[%c0_26, %c0_27] : memref<128x512xf32, #tpu.memory_space<vmem>>, vector<128x512xf32>
    %cst_28 = arith.constant dense<0.000000e+00> : vector<8x512xf32>
    %84 = tpu.matmul %75, %83, %cst_28 {dimension_numbers = #tpu.dot_dimension_numbers<[1], [0], [0], [1], [0, 0, 1, 1], [], []>} : vector<8x128xf32>, vector<128x512xf32>, vector<8x512xf32> -> vector<8x512xf32>
    %85 = arith.addf %82, %84 : vector<8x512xf32>
    %86 = vector.extract_strided_slice %85 {offsets = [0, 0], sizes = [8, 384], strides = [1, 1]} : vector<8x512xf32> to vector<8x384xf32>
    %87 = arith.negf %86 : vector<8x384xf32>
    %88 = math.exp %87 : vector<8x384xf32>
    %cst_29 = arith.constant 1.000000e+00 : f32
    %89 = vector.broadcast %cst_29 : f32 to vector<8x384xf32>
    %90 = arith.addf %89, %88 : vector<8x384xf32>
    %91 = arith.divf %89, %90 : vector<8x384xf32>
    %92 = vector.extract_strided_slice %91 {offsets = [0, 0], sizes = [8, 128], strides = [1, 1]} : vector<8x384xf32> to vector<8x128xf32>
    %93 = vector.extract_strided_slice %91 {offsets = [0, 128], sizes = [8, 128], strides = [1, 1]} : vector<8x384xf32> to vector<8x128xf32>
    %94 = vector.extract_strided_slice %91 {offsets = [0, 256], sizes = [8, 128], strides = [1, 1]} : vector<8x384xf32> to vector<8x128xf32>
    %95 = vector.extract_strided_slice %85 {offsets = [0, 384], sizes = [8, 128], strides = [1, 1]} : vector<8x512xf32> to vector<8x128xf32>
    %96 = math.tanh %95 : vector<8x128xf32>
    %97 = arith.mulf %93, %73 : vector<8x128xf32>
    %98 = arith.mulf %92, %96 : vector<8x128xf32>
    %99 = arith.addf %97, %98 : vector<8x128xf32>
    %100 = math.tanh %99 : vector<8x128xf32>
    %101 = arith.mulf %94, %100 : vector<8x128xf32>
    %102 = arith.index_cast %c3_i32 : i32 to index
    %c0_30 = arith.constant 0 : index
    %c0_31 = arith.constant 0 : index
    %103 = vector.load %arg3[%102, %c0_30, %c0_31] : memref<8x8x128xf32, #tpu.memory_space<vmem>>, vector<1x8x128xf32>
    %104 = vector.shape_cast %103 : vector<1x8x128xf32> to vector<8x128xf32>
    %105 = vector.shape_cast %101 : vector<8x128xf32> to vector<1x8x128xf32>
    tpu.vector_store %arg3[%102, %c0_30, %c0_31], %105 {strides = array<i32>} : memref<8x8x128xf32, #tpu.memory_space<vmem>>, vector<1x8x128xf32>,
    %c4_i32 = arith.constant 4 : i32
    %106 = arith.index_cast %c4_i32 : i32 to index
    %c0_32 = arith.constant 0 : index
    %c0_33 = arith.constant 0 : index
    %107 = vector.load %arg1[%106, %c0_32, %c0_33] : memref<8x8x512xf32, #tpu.memory_space<vmem>>, vector<1x8x512xf32>
    %108 = vector.shape_cast %107 : vector<1x8x512xf32> to vector<8x512xf32>
    %c0_34 = arith.constant 0 : index
    %c0_35 = arith.constant 0 : index
    %109 = vector.load %arg2[%c0_34, %c0_35] : memref<128x512xf32, #tpu.memory_space<vmem>>, vector<128x512xf32>
    %cst_36 = arith.constant dense<0.000000e+00> : vector<8x512xf32>
    %110 = tpu.matmul %101, %109, %cst_36 {dimension_numbers = #tpu.dot_dimension_numbers<[1], [0], [0], [1], [0, 0, 1, 1], [], []>} : vector<8x128xf32>, vector<128x512xf32>, vector<8x512xf32> -> vector<8x512xf32>
    %111 = arith.addf %108, %110 : vector<8x512xf32>
    %112 = vector.extract_strided_slice %111 {offsets = [0, 0], sizes = [8, 384], strides = [1, 1]} : vector<8x512xf32> to vector<8x384xf32>
    %113 = arith.negf %112 : vector<8x384xf32>
    %114 = math.exp %113 : vector<8x384xf32>
    %cst_37 = arith.constant 1.000000e+00 : f32
    %115 = vector.broadcast %cst_37 : f32 to vector<8x384xf32>
    %116 = arith.addf %115, %114 : vector<8x384xf32>
    %117 = arith.divf %115, %116 : vector<8x384xf32>
    %118 = vector.extract_strided_slice %117 {offsets = [0, 0], sizes = [8, 128], strides = [1, 1]} : vector<8x384xf32> to vector<8x128xf32>
    %119 = vector.extract_strided_slice %117 {offsets = [0, 128], sizes = [8, 128], strides = [1, 1]} : vector<8x384xf32> to vector<8x128xf32>
    %120 = vector.extract_strided_slice %117 {offsets = [0, 256], sizes = [8, 128], strides = [1, 1]} : vector<8x384xf32> to vector<8x128xf32>
    %121 = vector.extract_strided_slice %111 {offsets = [0, 384], sizes = [8, 128], strides = [1, 1]} : vector<8x512xf32> to vector<8x128xf32>
    %122 = math.tanh %121 : vector<8x128xf32>
    %123 = arith.mulf %119, %99 : vector<8x128xf32>
    %124 = arith.mulf %118, %122 : vector<8x128xf32>
    %125 = arith.addf %123, %124 : vector<8x128xf32>
    %126 = math.tanh %125 : vector<8x128xf32>
    %127 = arith.mulf %120, %126 : vector<8x128xf32>
    %128 = arith.index_cast %c4_i32 : i32 to index
    %c0_38 = arith.constant 0 : index
    %c0_39 = arith.constant 0 : index
    %129 = vector.load %arg3[%128, %c0_38, %c0_39] : memref<8x8x128xf32, #tpu.memory_space<vmem>>, vector<1x8x128xf32>
    %130 = vector.shape_cast %129 : vector<1x8x128xf32> to vector<8x128xf32>
    %131 = vector.shape_cast %127 : vector<8x128xf32> to vector<1x8x128xf32>
    tpu.vector_store %arg3[%128, %c0_38, %c0_39], %131 {strides = array<i32>} : memref<8x8x128xf32, #tpu.memory_space<vmem>>, vector<1x8x128xf32>,
    %c5_i32 = arith.constant 5 : i32
    %132 = arith.index_cast %c5_i32 : i32 to index
    %c0_40 = arith.constant 0 : index
    %c0_41 = arith.constant 0 : index
    %133 = vector.load %arg1[%132, %c0_40, %c0_41] : memref<8x8x512xf32, #tpu.memory_space<vmem>>, vector<1x8x512xf32>
    %134 = vector.shape_cast %133 : vector<1x8x512xf32> to vector<8x512xf32>
    %c0_42 = arith.constant 0 : index
    %c0_43 = arith.constant 0 : index
    %135 = vector.load %arg2[%c0_42, %c0_43] : memref<128x512xf32, #tpu.memory_space<vmem>>, vector<128x512xf32>
    %cst_44 = arith.constant dense<0.000000e+00> : vector<8x512xf32>
    %136 = tpu.matmul %127, %135, %cst_44 {dimension_numbers = #tpu.dot_dimension_numbers<[1], [0], [0], [1], [0, 0, 1, 1], [], []>} : vector<8x128xf32>, vector<128x512xf32>, vector<8x512xf32> -> vector<8x512xf32>
    %137 = arith.addf %134, %136 : vector<8x512xf32>
    %138 = vector.extract_strided_slice %137 {offsets = [0, 0], sizes = [8, 384], strides = [1, 1]} : vector<8x512xf32> to vector<8x384xf32>
    %139 = arith.negf %138 : vector<8x384xf32>
    %140 = math.exp %139 : vector<8x384xf32>
    %cst_45 = arith.constant 1.000000e+00 : f32
    %141 = vector.broadcast %cst_45 : f32 to vector<8x384xf32>
    %142 = arith.addf %141, %140 : vector<8x384xf32>
    %143 = arith.divf %141, %142 : vector<8x384xf32>
    %144 = vector.extract_strided_slice %143 {offsets = [0, 0], sizes = [8, 128], strides = [1, 1]} : vector<8x384xf32> to vector<8x128xf32>
    %145 = vector.extract_strided_slice %143 {offsets = [0, 128], sizes = [8, 128], strides = [1, 1]} : vector<8x384xf32> to vector<8x128xf32>
    %146 = vector.extract_strided_slice %143 {offsets = [0, 256], sizes = [8, 128], strides = [1, 1]} : vector<8x384xf32> to vector<8x128xf32>
    %147 = vector.extract_strided_slice %137 {offsets = [0, 384], sizes = [8, 128], strides = [1, 1]} : vector<8x512xf32> to vector<8x128xf32>
    %148 = math.tanh %147 : vector<8x128xf32>
    %149 = arith.mulf %145, %125 : vector<8x128xf32>
    %150 = arith.mulf %144, %148 : vector<8x128xf32>
    %151 = arith.addf %149, %150 : vector<8x128xf32>
    %152 = math.tanh %151 : vector<8x128xf32>
    %153 = arith.mulf %146, %152 : vector<8x128xf32>
    %154 = arith.index_cast %c5_i32 : i32 to index
    %c0_46 = arith.constant 0 : index
    %c0_47 = arith.constant 0 : index
    %155 = vector.load %arg3[%154, %c0_46, %c0_47] : memref<8x8x128xf32, #tpu.memory_space<vmem>>, vector<1x8x128xf32>
    %156 = vector.shape_cast %155 : vector<1x8x128xf32> to vector<8x128xf32>
    %157 = vector.shape_cast %153 : vector<8x128xf32> to vector<1x8x128xf32>
    tpu.vector_store %arg3[%154, %c0_46, %c0_47], %157 {strides = array<i32>} : memref<8x8x128xf32, #tpu.memory_space<vmem>>, vector<1x8x128xf32>,
    %c6_i32 = arith.constant 6 : i32
    %158 = arith.index_cast %c6_i32 : i32 to index
    %c0_48 = arith.constant 0 : index
    %c0_49 = arith.constant 0 : index
    %159 = vector.load %arg1[%158, %c0_48, %c0_49] : memref<8x8x512xf32, #tpu.memory_space<vmem>>, vector<1x8x512xf32>
    %160 = vector.shape_cast %159 : vector<1x8x512xf32> to vector<8x512xf32>
    %c0_50 = arith.constant 0 : index
    %c0_51 = arith.constant 0 : index
    %161 = vector.load %arg2[%c0_50, %c0_51] : memref<128x512xf32, #tpu.memory_space<vmem>>, vector<128x512xf32>
    %cst_52 = arith.constant dense<0.000000e+00> : vector<8x512xf32>
    %162 = tpu.matmul %153, %161, %cst_52 {dimension_numbers = #tpu.dot_dimension_numbers<[1], [0], [0], [1], [0, 0, 1, 1], [], []>} : vector<8x128xf32>, vector<128x512xf32>, vector<8x512xf32> -> vector<8x512xf32>
    %163 = arith.addf %160, %162 : vector<8x512xf32>
    %164 = vector.extract_strided_slice %163 {offsets = [0, 0], sizes = [8, 384], strides = [1, 1]} : vector<8x512xf32> to vector<8x384xf32>
    %165 = arith.negf %164 : vector<8x384xf32>
    %166 = math.exp %165 : vector<8x384xf32>
    %cst_53 = arith.constant 1.000000e+00 : f32
    %167 = vector.broadcast %cst_53 : f32 to vector<8x384xf32>
    %168 = arith.addf %167, %166 : vector<8x384xf32>
    %169 = arith.divf %167, %168 : vector<8x384xf32>
    %170 = vector.extract_strided_slice %169 {offsets = [0, 0], sizes = [8, 128], strides = [1, 1]} : vector<8x384xf32> to vector<8x128xf32>
    %171 = vector.extract_strided_slice %169 {offsets = [0, 128], sizes = [8, 128], strides = [1, 1]} : vector<8x384xf32> to vector<8x128xf32>
    %172 = vector.extract_strided_slice %169 {offsets = [0, 256], sizes = [8, 128], strides = [1, 1]} : vector<8x384xf32> to vector<8x128xf32>
    %173 = vector.extract_strided_slice %163 {offsets = [0, 384], sizes = [8, 128], strides = [1, 1]} : vector<8x512xf32> to vector<8x128xf32>
    %174 = math.tanh %173 : vector<8x128xf32>
    %175 = arith.mulf %171, %151 : vector<8x128xf32>
    %176 = arith.mulf %170, %174 : vector<8x128xf32>
    %177 = arith.addf %175, %176 : vector<8x128xf32>
    %178 = math.tanh %177 : vector<8x128xf32>
    %179 = arith.mulf %172, %178 : vector<8x128xf32>
    %180 = arith.index_cast %c6_i32 : i32 to index
    %c0_54 = arith.constant 0 : index
    %c0_55 = arith.constant 0 : index
    %181 = vector.load %arg3[%180, %c0_54, %c0_55] : memref<8x8x128xf32, #tpu.memory_space<vmem>>, vector<1x8x128xf32>
    %182 = vector.shape_cast %181 : vector<1x8x128xf32> to vector<8x128xf32>
    %183 = vector.shape_cast %179 : vector<8x128xf32> to vector<1x8x128xf32>
    tpu.vector_store %arg3[%180, %c0_54, %c0_55], %183 {strides = array<i32>} : memref<8x8x128xf32, #tpu.memory_space<vmem>>, vector<1x8x128xf32>,
    %c7_i32 = arith.constant 7 : i32
    %184 = arith.index_cast %c7_i32 : i32 to index
    %c0_56 = arith.constant 0 : index
    %c0_57 = arith.constant 0 : index
    %185 = vector.load %arg1[%184, %c0_56, %c0_57] : memref<8x8x512xf32, #tpu.memory_space<vmem>>, vector<1x8x512xf32>
    %186 = vector.shape_cast %185 : vector<1x8x512xf32> to vector<8x512xf32>
    %c0_58 = arith.constant 0 : index
    %c0_59 = arith.constant 0 : index
    %187 = vector.load %arg2[%c0_58, %c0_59] : memref<128x512xf32, #tpu.memory_space<vmem>>, vector<128x512xf32>
    %cst_60 = arith.constant dense<0.000000e+00> : vector<8x512xf32>
    %188 = tpu.matmul %179, %187, %cst_60 {dimension_numbers = #tpu.dot_dimension_numbers<[1], [0], [0], [1], [0, 0, 1, 1], [], []>} : vector<8x128xf32>, vector<128x512xf32>, vector<8x512xf32> -> vector<8x512xf32>
    %189 = arith.addf %186, %188 : vector<8x512xf32>
    %190 = vector.extract_strided_slice %189 {offsets = [0, 0], sizes = [8, 384], strides = [1, 1]} : vector<8x512xf32> to vector<8x384xf32>
    %191 = arith.negf %190 : vector<8x384xf32>
    %192 = math.exp %191 : vector<8x384xf32>
    %cst_61 = arith.constant 1.000000e+00 : f32
    %193 = vector.broadcast %cst_61 : f32 to vector<8x384xf32>
    %194 = arith.addf %193, %192 : vector<8x384xf32>
    %195 = arith.divf %193, %194 : vector<8x384xf32>
    %196 = vector.extract_strided_slice %195 {offsets = [0, 0], sizes = [8, 128], strides = [1, 1]} : vector<8x384xf32> to vector<8x128xf32>
    %197 = vector.extract_strided_slice %195 {offsets = [0, 128], sizes = [8, 128], strides = [1, 1]} : vector<8x384xf32> to vector<8x128xf32>
    %198 = vector.extract_strided_slice %195 {offsets = [0, 256], sizes = [8, 128], strides = [1, 1]} : vector<8x384xf32> to vector<8x128xf32>
    %199 = vector.extract_strided_slice %189 {offsets = [0, 384], sizes = [8, 128], strides = [1, 1]} : vector<8x512xf32> to vector<8x128xf32>
    %200 = math.tanh %199 : vector<8x128xf32>
    %201 = arith.mulf %197, %177 : vector<8x128xf32>
    %202 = arith.mulf %196, %200 : vector<8x128xf32>
    %203 = arith.addf %201, %202 : vector<8x128xf32>
    %204 = math.tanh %203 : vector<8x128xf32>
    %205 = arith.mulf %198, %204 : vector<8x128xf32>
    %206 = arith.index_cast %c7_i32 : i32 to index
    %c0_62 = arith.constant 0 : index
    %c0_63 = arith.constant 0 : index
    %207 = vector.load %arg3[%206, %c0_62, %c0_63] : memref<8x8x128xf32, #tpu.memory_space<vmem>>, vector<1x8x128xf32>
    %208 = vector.shape_cast %207 : vector<1x8x128xf32> to vector<8x128xf32>
    %209 = vector.shape_cast %205 : vector<8x128xf32> to vector<1x8x128xf32>
    tpu.vector_store %arg3[%206, %c0_62, %c0_63], %209 {strides = array<i32>} : memref<8x8x128xf32, #tpu.memory_space<vmem>>, vector<1x8x128xf32>,
    %c8_i32 = arith.constant 8 : i32
    return
  }
  func.func @transform_0(%arg0: i32) -> (i32, i32, i32) {
    %c0_i32 = arith.constant 0 : i32
    %c0_i32_0 = arith.constant 0 : i32
    %c0_i32_1 = arith.constant 0 : i32
    return %c0_i32, %arg0, %c0_i32_0 : i32, i32, i32
  }
  func.func @transform_1(%arg0: i32) -> (i32, i32) {
    %c0_i32 = arith.constant 0 : i32
    %c0_i32_0 = arith.constant 0 : i32
    %c0_i32_1 = arith.constant 0 : i32
    return %c0_i32, %c0_i32_0 : i32, i32
  }
  func.func @transform_2(%arg0: i32) -> (i32, i32, i32) {
    %c0_i32 = arith.constant 0 : i32
    %c0_i32_0 = arith.constant 0 : i32
    %c0_i32_1 = arith.constant 0 : i32
    return %c0_i32, %arg0, %c0_i32_0 : i32, i32, i32
  }
}

</mosaic_0001>

<bundles_post_ra>
// kernel: short_sequence_forward.1
= control target key start
LH: loop header
LB: loop body
LE: loop exit
PB: predicated region body
PF: predicated region fallthrough
CT: control target
= control target key end

     0   :  { %v2641_v3 = vmov 0.0   ;;  %s3637_s1 = inlined_call_operand.vmem [shape: f32[128,512], index: 1, kind: input, shape index: {}]   ;;  %s3638_s0 = inlined_call_operand.vmem [shape: f32[8,8,512], index: 0, kind: input, shape index: {}]   ;;  %s3639_s2 = inlined_call_operand.vmem [shape: f32[8,8,128], index: 2, kind: output, shape index: {}]  }
   0x1   :  { %v16_v0 = vld [vmem:[%s3637_s1 + $0x8] sm:$0xff]  ;;  %v15_v2 = vld [vmem:[%s3637_s1] sm:$0xff]  ;;  %143 = vmatprep.mubr.f32.mxu0 %v2641_v3  ;;  %214 = vmatprep.mubr.f32.mxu1 %v2641_v3  ;;  %v18_v19 = vld [vmem:[%s3637_s1 + $0x18] sm:$0xff] }
   0x2   :  { %v20_v1 = vld [vmem:[%s3637_s1 + $0x28] sm:$0xff]  ;;  %v19_v5 = vld [vmem:[%s3637_s1 + $0x20] sm:$0xff]  ;;  %v22_v20 = vld [vmem:[%s3637_s1 + $0x38] sm:$0xff] }
   0x3   :  { %v2668_v4 = vpack.c.bf16 %v20_v1, %v16_v0  ;;  %v24_v6 = vld [vmem:[%s3637_s1 + $0x48] sm:$0xff]  ;;  %v2679_v8 = vpack.c.bf16 %v19_v5, %v15_v2  ;;  %v23_v10 = vld [vmem:[%s3637_s1 + $0x40] sm:$0xff]  ;;  %v2720_v22 = vpack.c.bf16 %v22_v20, %v18_v19  ;;  %v17_v23 = vld [vmem:[%s3637_s1 + $0x10] sm:$0xff] }
   0x4   :  { %v28_v7 = vld [vmem:[%s3637_s1 + $0x68] sm:$0xff]  ;;  %v27_v11 = vld [vmem:[%s3637_s1 + $0x60] sm:$0xff]  ;;  %v21_v24 = vld [vmem:[%s3637_s1 + $0x30] sm:$0xff] }
   0x5   :  { %v2681_v9 = vpack.c.bf16 %v28_v7, %v24_v6  ;;  %v32_v12 = vld [vmem:[%s3637_s1 + $0x88] sm:$0xff]  ;;  %2001 = vmatprep.subr.bf16.mxu0 %v2668_v4  ;;  %v2697_v14 = vpack.c.bf16 %v27_v11, %v23_v10  ;;  %v31_v15 = vld [vmem:[%s3637_s1 + $0x80] sm:$0xff]  ;;  %v2728_v25 = vpack.c.bf16 %v21_v24, %v17_v23  ;;  %2033 = vmatprep.subr.bf16.mxu1 %v2720_v22  ;;  %v26_v27 = vld [vmem:[%s3637_s1 + $0x58] sm:$0xff] }
   0x6   :  { %v36_v13 = vld [vmem:[%s3637_s1 + $0xa8] sm:$0xff]  ;;  %2003 = vmatpush1.bf16.msra.mxu0 %v2679_v8  ;;  %v35_v16 = vld [vmem:[%s3637_s1 + $0xa0] sm:$0xff]  ;;  %v30_v28 = vld [vmem:[%s3637_s1 + $0x78] sm:$0xff] }
   0x7   :  { %2005 = vmatprep.subr.bf16.mxu0 %v2681_v9  ;;  %v2706_v17 = vpack.c.bf16 %v36_v13, %v32_v12  ;;  %v40_v18 = vld [vmem:[%s3637_s1 + $0xc8] sm:$0xff]  ;;  %v2731_v26 = vpack.c.bf16 %v35_v16, %v31_v15  ;;  %v25_v29 = vld [vmem:[%s3637_s1 + $0x50] sm:$0xff]  ;;  %v39_v31 = vld [vmem:[%s3637_s1 + $0xc0] sm:$0xff]  ;;  %2035 = vmatpush1.bf16.msra.mxu1 %v2728_v25  ;;  %v2753_v33 = vpack.c.bf16 %v30_v28, %v26_v27 }
   0x8   :  { %v44_v21 = vld [vmem:[%s3637_s1 + $0xe8] sm:$0xff]  ;;  %v43_v32 = vld [vmem:[%s3637_s1 + $0xe0] sm:$0xff]  ;;  %v29_v34 = vld [vmem:[%s3637_s1 + $0x70] sm:$0xff] }
   0x9   :  { %v2744_v30 = vpack.c.bf16 %v44_v21, %v40_v18  ;;  %v48_v35 = vld [vmem:[%s3637_s1 + $0x108] sm:$0xff]  ;;  %v2764_v37 = vpack.c.bf16 %v29_v34, %v25_v29  ;;  %v34_v38 = vld [vmem:[%s3637_s1 + $0x98] sm:$0xff]  ;;  %2037 = vmatprep.subr.bf16.mxu1 %v2753_v33  ;;  %v33_v40 = vld [vmem:[%s3637_s1 + $0x90] sm:$0xff]  ;;  %v2780_v42 = vpack.c.bf16 %v43_v32, %v39_v31 }
   0xa   :  { %2007 = vmatpush1.bf16.msra.mxu0 %v2697_v14  ;;  %v52_v36 = vld [vmem:[%s3637_s1 + $0x128] sm:$0xff]  ;;  %v38_v39 = vld [vmem:[%s3637_s1 + $0xb8] sm:$0xff]  ;;  %v37_v41 = vld [vmem:[%s3637_s1 + $0xb0] sm:$0xff] }
   0xb   :  { %2009 = vmatprep.subr.bf16.mxu0 %v2706_v17  ;;  %v47_v43 = vld [vmem:[%s3637_s1 + $0x100] sm:$0xff]  ;;  %v2788_v45 = vpack.c.bf16 %v38_v39, %v34_v38  ;;  %v2791_v46 = vpack.c.bf16 %v52_v36, %v48_v35  ;;  %2039 = vmatpush1.bf16.msra.mxu1 %v2764_v37  ;;  %v56_v47 = vld [vmem:[%s3637_s1 + $0x148] sm:$0xff]  ;;  %v2797_v48 = vpack.c.bf16 %v37_v41, %v33_v40  ;;  %v42_v49 = vld [vmem:[%s3637_s1 + $0xd8] sm:$0xff] }
   0xc   :  { %v51_v44 = vld [vmem:[%s3637_s1 + $0x120] sm:$0xff]  ;;  %v46_v50 = vld [vmem:[%s3637_s1 + $0xf8] sm:$0xff]  ;;  %v60_v51 = vld [vmem:[%s3637_s1 + $0x168] sm:$0xff] }
   0xd   :  { %2041 = vmatprep.subr.bf16.mxu1 %v2788_v45  ;;  %v2809_v52 = vpack.c.bf16 %v46_v50, %v42_v49  ;;  %v41_v53 = vld [vmem:[%s3637_s1 + $0xd0] sm:$0xff]  ;;  %v2818_v55 = vpack.c.bf16 %v51_v44, %v47_v43  ;;  %v50_v56 = vld [vmem:[%s3637_s1 + $0x118] sm:$0xff]  ;;  %v2827_v58 = vpack.c.bf16 %v60_v51, %v56_v47  ;;  %v55_v59 = vld [vmem:[%s3637_s1 + $0x140] sm:$0xff] }
   0xe   :  { %2011 = vmatpush1.bf16.msra.mxu0 %v2731_v26  ;;  %v45_v54 = vld [vmem:[%s3637_s1 + $0xf0] sm:$0xff]  ;;  %v54_v57 = vld [vmem:[%s3637_s1 + $0x138] sm:$0xff]  ;;  %v59_v60 = vld [vmem:[%s3637_s1 + $0x160] sm:$0xff] }
   0xf   :  { %2013 = vmatprep.subr.bf16.mxu0 %v2744_v30  ;;  %2043 = vmatpush1.bf16.msra.mxu1 %v2797_v48  ;;  %v64_v61 = vld [vmem:[%s3637_s1 + $0x188] sm:$0xff]  ;;  %v2839_v62 = vpack.c.bf16 %v45_v54, %v41_v53  ;;  %v2845_v0 = vpack.c.bf16 %v54_v57, %v50_v56  ;;  %v49_v1 = vld [vmem:[%s3637_s1 + $0x110] sm:$0xff]  ;;  %v58_v5 = vld [vmem:[%s3637_s1 + $0x158] sm:$0xff]  ;;  %v2860_v7 = vpack.c.bf16 %v59_v60, %v55_v59 }
  0x10   :  { %v68_v63 = vld [vmem:[%s3637_s1 + $0x1a8] sm:$0xff]  ;;  %2045 = vmatprep.subr.bf16.mxu1 %v2809_v52  ;;  %v53_v2 = vld [vmem:[%s3637_s1 + $0x130] sm:$0xff]  ;;  %v62_v6 = vld [vmem:[%s3637_s1 + $0x178] sm:$0xff] }
  0x11   :  { %v2863_v10 = vpack.c.bf16 %v68_v63, %v64_v61  ;;  %v63_v11 = vld [vmem:[%s3637_s1 + $0x180] sm:$0xff]  ;;  %v72_v13 = vld [vmem:[%s3637_s1 + $0x1c8] sm:$0xff]  ;;  %v2875_v15 = vpack.c.bf16 %v53_v2, %v49_v1  ;;  %v2881_v18 = vpack.c.bf16 %v62_v6, %v58_v5  ;;  %v57_v19 = vld [vmem:[%s3637_s1 + $0x150] sm:$0xff] }
  0x12   :  { %2015 = vmatpush1.bf16.msra.mxu0 %v2780_v42  ;;  %v67_v12 = vld [vmem:[%s3637_s1 + $0x1a0] sm:$0xff]  ;;  %v76_v16 = vld [vmem:[%s3637_s1 + $0x1e8] sm:$0xff]  ;;  %v61_v20 = vld [vmem:[%s3637_s1 + $0x170] sm:$0xff] }
  0x13   :  { %2017 = vmatprep.subr.bf16.mxu0 %v2791_v46  ;;  %2047 = vmatpush1.bf16.msra.mxu1 %v2839_v62  ;;  %v66_v21 = vld [vmem:[%s3637_s1 + $0x198] sm:$0xff]  ;;  %v2896_v24 = vpack.c.bf16 %v67_v12, %v63_v11  ;;  %v2899_v27 = vpack.c.bf16 %v76_v16, %v72_v13  ;;  %v71_v28 = vld [vmem:[%s3637_s1 + $0x1c0] sm:$0xff]  ;;  %v2908_v31 = vpack.c.bf16 %v61_v20, %v57_v19  ;;  %v65_v34 = vld [vmem:[%s3637_s1 + $0x190] sm:$0xff] }
  0x14   :  { %2049 = vmatprep.subr.bf16.mxu1 %v2845_v0  ;;  %v70_v23 = vld [vmem:[%s3637_s1 + $0x1b8] sm:$0xff]  ;;  %v75_v29 = vld [vmem:[%s3637_s1 + $0x1e0] sm:$0xff]  ;;  %v69_v35 = vld [vmem:[%s3637_s1 + $0x1b0] sm:$0xff] }
  0x15   :  { %v2911_v32 = vpack.c.bf16 %v70_v23, %v66_v21  ;;  %v74_v36 = vld [vmem:[%s3637_s1 + $0x1d8] sm:$0xff]  ;;  %v2926_v39 = vpack.c.bf16 %v75_v29, %v71_v28  ;;  %v2930_v40 = vpack.c.bf16 %v69_v35, %v65_v34  ;;  %v73_v43 = vld [vmem:[%s3637_s1 + $0x1d0] sm:$0xff]  ;;  %v11_v49 = vld [vmem:[%s3638_s0] sm:$0xff] }
  0x16   :  { %2019 = vmatpush1.bf16.msra.mxu0 %v2818_v55  ;;  %v78_v38 = vld [vmem:[%s3637_s1 + $0x1f8] sm:$0xff]  ;;  %v77_v44 = vld [vmem:[%s3637_s1 + $0x1f0] sm:$0xff]  ;;  %v12_v50 = vld [vmem:[%s3638_s0 + $0x8] sm:$0xff] }
  0x17   :  { %2021 = vmatprep.subr.bf16.mxu0 %v2827_v58  ;;  %2051 = vmatpush1.bf16.msra.mxu1 %v2875_v15  ;;  %v2933_v41 = vpack.c.bf16 %v78_v38, %v74_v36  ;;  %v2943_v47 = vpack.c.bf16 %v77_v44, %v73_v43  ;;  %v13_v60 = vld [vmem:[%s3638_s0 + $0x10] sm:$0xff]  ;;  %v14_v2 = vld [vmem:[%s3638_s0 + $0x18] sm:$0xff] }
  0x18   :  { %2053 = vmatprep.subr.bf16.mxu1 %v2881_v18  ;;  %v1947_v44 = vld [vmem:[%s3638_s0 + $0x38] sm:$0xff] }
  0x1a   :  { %2023 = vmatpush1.bf16.msra.mxu0 %v2860_v7 }
  0x1b   :  { %2025 = vmatprep.subr.bf16.mxu0 %v2863_v10  ;;  %2055 = vmatpush1.bf16.msra.mxu1 %v2908_v31 }
  0x1c   :  { %2057 = vmatprep.subr.bf16.mxu1 %v2911_v32 }
  0x1e   :  { %2027 = vmatpush1.bf16.msra.mxu0 %v2896_v24 }
  0x1f   :  { %2029 = vmatprep.subr.bf16.mxu0 %v2899_v27  ;;  %2059 = vmatpush1.bf16.msra.mxu1 %v2930_v40 }
  0x20   :  { %2061 = vmatprep.subr.bf16.mxu1 %v2933_v41 }
  0x22   :  { %2031 = vmatpush1.bf16.msra.mxu0 %v2926_v39 }
  0x23   :  { %2065 = vmatprep.subr.bf16.mxu0 %v2668_v4  ;;  %2063 = vmatpush1.bf16.msra.mxu1 %v2943_v47 }
  0x24   :  { %2097 = vmatprep.subr.bf16.mxu1 %v2720_v22 }
  0x25   :  { %144 = vmatmul.mubr.f32.vlgmr.msra.gmra.mrb[0].mxu0 %v2641_v3 }
  0x26   :  { %2067 = vmatpush1.bf16.msra.mxu0 %v2679_v8  ;;  %383 = vmatprep.mubr.f32.mxu0 %v2641_v3 }
  0x27   :  { %2069 = vmatprep.subr.bf16.mxu0 %v2681_v9  ;;  %215 = vmatmul.mubr.f32.vlgmr.msra.gmra.mrb[0].mxu1 %v2641_v3 }
  0x28   :  { %2099 = vmatpush1.bf16.msra.mxu1 %v2728_v25  ;;  %454 = vmatprep.mubr.f32.mxu1 %v2641_v3 }
  0x29   :  { %2101 = vmatprep.subr.bf16.mxu1 %v2753_v33 }
  0x2a   :  { %2071 = vmatpush1.bf16.msra.mxu0 %v2697_v14 }
  0x2b   :  { %2073 = vmatprep.subr.bf16.mxu0 %v2706_v17 }
  0x2c   :  { %2103 = vmatpush1.bf16.msra.mxu1 %v2764_v37 }
  0x2d   :  { %2105 = vmatprep.subr.bf16.mxu1 %v2788_v45 }
  0x2e   :  { %2075 = vmatpush1.bf16.msra.mxu0 %v2731_v26 }
  0x2f   :  { %2077 = vmatprep.subr.bf16.mxu0 %v2744_v30 }
  0x30   :  { %2107 = vmatpush1.bf16.msra.mxu1 %v2797_v48 }
  0x31   :  { %2109 = vmatprep.subr.bf16.mxu1 %v2809_v52 }
  0x32   :  { %2079 = vmatpush1.bf16.msra.mxu0 %v2780_v42 }
  0x33   :  { %2081 = vmatprep.subr.bf16.mxu0 %v2791_v46 }
  0x34   :  { %2111 = vmatpush1.bf16.msra.mxu1 %v2839_v62 }
  0x35   :  { %2113 = vmatprep.subr.bf16.mxu1 %v2845_v0 }
  0x36   :  { %2083 = vmatpush1.bf16.msra.mxu0 %v2818_v55 }
  0x37   :  { %2085 = vmatprep.subr.bf16.mxu0 %v2827_v58 }
  0x38   :  { %2115 = vmatpush1.bf16.msra.mxu1 %v2875_v15 }
  0x39   :  { %2117 = vmatprep.subr.bf16.mxu1 %v2881_v18 }
  0x3a   :  { %2087 = vmatpush1.bf16.msra.mxu0 %v2860_v7 }
  0x3b   :  { %2089 = vmatprep.subr.bf16.mxu0 %v2863_v10 }
  0x3c   :  { %2119 = vmatpush1.bf16.msra.mxu1 %v2908_v31 }
  0x3d   :  { %2121 = vmatprep.subr.bf16.mxu1 %v2911_v32 }
  0x3e   :  { %2091 = vmatpush1.bf16.msra.mxu0 %v2896_v24 }
  0x3f   :  { %2093 = vmatprep.subr.bf16.mxu0 %v2899_v27 }
  0x40   :  { %2123 = vmatpush1.bf16.msra.mxu1 %v2930_v40 }
  0x41   :  { %2125 = vmatprep.subr.bf16.mxu1 %v2933_v41 }
  0x42   :  { %2095 = vmatpush1.bf16.msra.mxu0 %v2926_v39 }
  0x43   :  { %2129 = vmatprep.subr.bf16.mxu0 %v2668_v4 }
  0x44   :  { %2127 = vmatpush1.bf16.msra.mxu1 %v2943_v47 }
  0x45   :  { %2161 = vmatprep.subr.bf16.mxu1 %v2720_v22 }
  0xf8   :  { %v145_v51 = vpop.f32.mrb[0].mxu0 }
  0xf9   :  { %v221_v53 = vadd.f32 %v145_v51, %v11_v49  ;;  %v147_v54 = vpop.f32.mrb[1].mxu0 }
  0xfa   :  { %v222_v56 = vadd.f32 %v147_v54, %v12_v50  ;;  %v216_v61 = vpop.f32.mrb[0].mxu1 }
  0xfb   :  { %v1941_v57 = vmul.f32 -1.442695, %v221_v53  ;;  %v218_v63 = vpop.f32.mrb[1].mxu1  ;;  %v223_v1 = vadd.f32 %v216_v61, %v13_v60 }
  0xfc   :  { %v1942_v59 = vmul.f32 -1.442695, %v222_v56  ;;  %v224_v6 = vadd.f32 %v218_v63, %v14_v2 }
  0xfd   :  { %2513 = vpow2.f32 %v1941_v57  ;;  %v1943_v5 = vmul.f32 -1.442695, %v223_v1 }
  0xfe   :  { %2515 = vpow2.f32 %v1942_v59 }
  0xff   :  { %2517 = vpow2.f32 %v1943_v5 }
 0x100   :  { %2519 = vtanh.f32 %v224_v6 }
 0x107   :  { %v2514_v11 = vpop.eup %2513 }
 0x108   :  { %v2516_v12 = vpop.eup %2515  ;;  %v234_v13 = vadd.f32 1.0, %v2514_v11 }
 0x109   :  { %v235_v16 = vadd.f32 1.0, %v2516_v12  ;;  %v2518_v19 = vpop.eup %2517 }
 0x10a   :  { %2521 = vrcp.f32 %v234_v13  ;;  %v2520_v20 = vpop.eup %2519  ;;  %v236_v23 = vadd.f32 1.0, %v2518_v19  ;;  %v785_v13 = vld [vmem:[%s3637_s1 + $0x180] sm:$0xff] }
 0x10b   :  { %2523 = vrcp.f32 %v235_v16  ;;  %v789_v19 = vld [vmem:[%s3637_s1 + $0x1a0] sm:$0xff] }
 0x10c   :  { %2525 = vrcp.f32 %v236_v23  ;;  %v3152_v23 = vpack.c.bf16 %v789_v19, %v785_v13  ;;  %v986_v13 = vld [vmem:[%s3637_s1 + $0x40] sm:$0xff] }
 0x10d   :  { %v990_v19 = vld [vmem:[%s3637_s1 + $0x60] sm:$0xff] }
 0x114   :  { %v2522_v21 = vpop.eup %2521 }
 0x115   :  { %v2524_v28 = vpop.eup %2523  ;;  %v245_v29 = vmul.f32 %v2522_v21, %v2520_v20  ;;  %v794_v20 = vld [vmem:[%s3637_s1 + $0x1c8] sm:$0xff] }
 0x116   :  { %v244_v34 = vmul.f32 0.0, %v2524_v28  ;;  %v2526_v36 = vpop.eup %2525  ;;  %v798_v21 = vld [vmem:[%s3637_s1 + $0x1e8] sm:$0xff] }
 0x117   :  { %v3155_v28 = vpack.c.bf16 %v798_v21, %v794_v20  ;;  %v3247_v21 = vpack.c.bf16 %v990_v19, %v986_v13  ;;  %v1040_v13 = vld [vmem:[%s3637_s1 + $0x1f0] sm:$0xff] }
 0x118   :  { %v2997_v35 = vadd.f32 %v245_v29, %v244_v34  ;;  %v793_v29 = vld [vmem:[%s3637_s1 + $0x1c0] sm:$0xff] }
 0x119   :  { %v797_v34 = vld [vmem:[%s3637_s1 + $0x1e0] sm:$0xff] }
 0x11a   :  { %2527 = vtanh.f32 %v2997_v35 }
 0x124   :  { %v2528_v38 = vpop.eup %2527 }
 0x125   :  { %v248_v43 = vmul.f32 %v2528_v38, %v2526_v36  ;;  %v1952_v36 = vld [vmem:[%s3638_s0 + $0x40] sm:$0xff]  ;;  %v1953_v38 = vld [vmem:[%s3638_s0 + $0x48] sm:$0xff] }
 0x127   :  { %249 = vst [vmem:[%s3639_s2] sm:$0xff] %v248_v43  ;;  %384 = vmatmul.mubr.f32.vlgmr.msra.gmra.mrb[2].mxu0 %v248_v43  ;;  %455 = vmatmul.mubr.f32.vlgmr.msra.gmra.mrb[2].mxu1 %v248_v43 }
 0x128   :  { %2131 = vmatpush1.bf16.msra.mxu0 %v2679_v8  ;;  %2163 = vmatpush1.bf16.msra.mxu1 %v2728_v25 }
 0x129   :  { %2133 = vmatprep.subr.bf16.mxu0 %v2681_v9  ;;  %2165 = vmatprep.subr.bf16.mxu1 %v2753_v33 }
 0x12a   :  { %624 = vmatprep.mubr.f32.mxu0 %v2641_v3  ;;  %695 = vmatprep.mubr.f32.mxu1 %v2641_v3 }
 0x12c   :  { %2135 = vmatpush1.bf16.msra.mxu0 %v2697_v14  ;;  %2167 = vmatpush1.bf16.msra.mxu1 %v2764_v37 }
 0x12d   :  { %2137 = vmatprep.subr.bf16.mxu0 %v2706_v17  ;;  %2169 = vmatprep.subr.bf16.mxu1 %v2788_v45 }
 0x130   :  { %2139 = vmatpush1.bf16.msra.mxu0 %v2731_v26  ;;  %2171 = vmatpush1.bf16.msra.mxu1 %v2797_v48 }
 0x131   :  { %2141 = vmatprep.subr.bf16.mxu0 %v2744_v30  ;;  %2173 = vmatprep.subr.bf16.mxu1 %v2809_v52  ;;  %v1944_v30 = vld [vmem:[%s3638_s0 + $0x20] sm:$0xff] }
 0x134   :  { %2143 = vmatpush1.bf16.msra.mxu0 %v2780_v42  ;;  %2175 = vmatpush1.bf16.msra.mxu1 %v2839_v62  ;;  %v1945_v42 = vld [vmem:[%s3638_s0 + $0x28] sm:$0xff] }
 0x135   :  { %2145 = vmatprep.subr.bf16.mxu0 %v2791_v46  ;;  %2177 = vmatprep.subr.bf16.mxu1 %v2845_v0 }
 0x138   :  { %2147 = vmatpush1.bf16.msra.mxu0 %v2818_v55  ;;  %2179 = vmatpush1.bf16.msra.mxu1 %v2875_v15 }
 0x139   :  { %2149 = vmatprep.subr.bf16.mxu0 %v2827_v58  ;;  %2181 = vmatprep.subr.bf16.mxu1 %v2881_v18 }
 0x13c   :  { %2151 = vmatpush1.bf16.msra.mxu0 %v2860_v7  ;;  %2183 = vmatpush1.bf16.msra.mxu1 %v2908_v31 }
 0x13d   :  { %2153 = vmatprep.subr.bf16.mxu0 %v2863_v10  ;;  %2185 = vmatprep.subr.bf16.mxu1 %v2911_v32 }
 0x140   :  { %2155 = vmatpush1.bf16.msra.mxu0 %v2896_v24  ;;  %2187 = vmatpush1.bf16.msra.mxu1 %v2930_v40 }
 0x141   :  { %2157 = vmatprep.subr.bf16.mxu0 %v2899_v27  ;;  %2189 = vmatprep.subr.bf16.mxu1 %v2933_v41 }
 0x144   :  { %2159 = vmatpush1.bf16.msra.mxu0 %v2926_v39  ;;  %2191 = vmatpush1.bf16.msra.mxu1 %v2943_v47 }
 0x145   :  { %2193 = vmatprep.subr.bf16.mxu0 %v2668_v4  ;;  %2225 = vmatprep.subr.bf16.mxu1 %v2720_v22  ;;  %v1946_v4 = vld [vmem:[%s3638_s0 + $0x30] sm:$0xff] }
 0x1fa   :  { %v385_v46 = vpop.f32.mrb[2].mxu0  ;;  %v456_v55 = vpop.f32.mrb[2].mxu1 }
 0x1fb   :  { %v461_v58 = vadd.f32 %v1944_v30, %v385_v46  ;;  %v387_v7 = vpop.f32.mrb[3].mxu0  ;;  %v458_v10 = vpop.f32.mrb[3].mxu1  ;;  %v463_v22 = vadd.f32 %v1946_v4, %v456_v55 }
 0x1fc   :  { %v462_v24 = vadd.f32 %v1945_v42, %v387_v7  ;;  %v464_v49 = vadd.f32 %v1947_v44, %v458_v10 }
 0x1fd   :  { %v1948_v27 = vmul.f32 -1.442695, %v461_v58  ;;  %v1950_v50 = vmul.f32 -1.442695, %v463_v22 }
 0x1fe   :  { %v1949_v39 = vmul.f32 -1.442695, %v462_v24  ;;  %v1954_v24 = vld [vmem:[%s3638_s0 + $0x50] sm:$0xff] }
 0x1ff   :  { %2529 = vpow2.f32 %v1948_v27 }
 0x200   :  { %2531 = vpow2.f32 %v1949_v39  ;;  %v1955_v39 = vld [vmem:[%s3638_s0 + $0x58] sm:$0xff] }
 0x201   :  { %2533 = vtanh.f32 %v464_v49 }
 0x202   :  { %2535 = vpow2.f32 %v1950_v50 }
 0x209   :  { %v2530_v51 = vpop.eup %2529 }
 0x20a   :  { %v474_v53 = vadd.f32 1.0, %v2530_v51  ;;  %v2532_v54 = vpop.eup %2531 }
 0x20b   :  { %v475_v56 = vadd.f32 1.0, %v2532_v54  ;;  %v2534_v57 = vpop.eup %2533 }
 0x20c   :  { %2537 = vrcp.f32 %v474_v53  ;;  %v2536_v59 = vpop.eup %2535 }
 0x20d   :  { %2539 = vrcp.f32 %v475_v56  ;;  %v476_v1 = vadd.f32 1.0, %v2536_v59 }
 0x20f   :  { %2541 = vrcp.f32 %v476_v1 }
 0x216   :  { %v2538_v60 = vpop.eup %2537 }
 0x217   :  { %v485_v61 = vmul.f32 %v2538_v60, %v2534_v57  ;;  %v2540_v63 = vpop.eup %2539 }
 0x218   :  { %v484_v2 = vmul.f32 %v2540_v63, %v2997_v35  ;;  %v3164_v35 = vpack.c.bf16 %v797_v34, %v793_v29  ;;  %v988_v29 = vld [vmem:[%s3637_s1 + $0x50] sm:$0xff] }
 0x219   :  { %v2542_v6 = vpop.eup %2541  ;;  %v992_v34 = vld [vmem:[%s3637_s1 + $0x70] sm:$0xff] }
 0x21a   :  { %v3050_v5 = vadd.f32 %v485_v61, %v484_v2 }
 0x21c   :  { %2543 = vtanh.f32 %v3050_v5 }
 0x226   :  { %v2544_v11 = vpop.eup %2543 }
 0x227   :  { %v488_v12 = vmul.f32 %v2544_v11, %v2542_v6  ;;  %v983_v11 = vld [vmem:[%s3637_s1 + $0x28] sm:$0xff] }
 0x229   :  { %1951 = vst [vmem:[%s3639_s2 + $0x8] sm:$0xff] %v488_v12  ;;  %625 = vmatmul.mubr.f32.vlgmr.msra.gmra.mrb[4].mxu0 %v488_v12  ;;  %696 = vmatmul.mubr.f32.vlgmr.msra.gmra.mrb[4].mxu1 %v488_v12  ;;  %v981_v12 = vld [vmem:[%s3637_s1 + $0x18] sm:$0xff] }
 0x22a   :  { %2195 = vmatpush1.bf16.msra.mxu0 %v2679_v8  ;;  %2227 = vmatpush1.bf16.msra.mxu1 %v2728_v25  ;;  %v762_v8 = vld [vmem:[%s3637_s1 + $0xc8] sm:$0xff]  ;;  %v765_v25 = vld [vmem:[%s3637_s1 + $0xe0] sm:$0xff] }
 0x22b   :  { %2197 = vmatprep.subr.bf16.mxu0 %v2681_v9  ;;  %2229 = vmatprep.subr.bf16.mxu1 %v2753_v33  ;;  %v766_v9 = vld [vmem:[%s3637_s1 + $0xe8] sm:$0xff] }
 0x22c   :  { %865 = vmatprep.mubr.f32.mxu0 %v2641_v3  ;;  %936 = vmatprep.mubr.f32.mxu1 %v2641_v3  ;;  %v770_v33 = vld [vmem:[%s3637_s1 + $0x108] sm:$0xff] }
 0x22e   :  { %2199 = vmatpush1.bf16.msra.mxu0 %v2697_v14  ;;  %2231 = vmatpush1.bf16.msra.mxu1 %v2764_v37  ;;  %v3084_v14 = vpack.c.bf16 %v766_v9, %v762_v8  ;;  %v774_v37 = vld [vmem:[%s3637_s1 + $0x128] sm:$0xff]  ;;  %v985_v9 = vld [vmem:[%s3637_s1 + $0x38] sm:$0xff] }
 0x22f   :  { %2201 = vmatprep.subr.bf16.mxu0 %v2706_v17  ;;  %2233 = vmatprep.subr.bf16.mxu1 %v2788_v45  ;;  %v761_v17 = vld [vmem:[%s3637_s1 + $0xc0] sm:$0xff]  ;;  %v3102_v45 = vpack.c.bf16 %v774_v37, %v770_v33  ;;  %v3209_v33 = vpack.c.bf16 %v985_v9, %v981_v12  ;;  %v1029_v12 = vld [vmem:[%s3637_s1 + $0x198] sm:$0xff] }
 0x230   :  { %v1033_v9 = vld [vmem:[%s3637_s1 + $0x1b8] sm:$0xff] }
 0x232   :  { %2203 = vmatpush1.bf16.msra.mxu0 %v2731_v26  ;;  %2235 = vmatpush1.bf16.msra.mxu1 %v2797_v48  ;;  %v3092_v26 = vpack.c.bf16 %v765_v25, %v761_v17  ;;  %v769_v48 = vld [vmem:[%s3637_s1 + $0x100] sm:$0xff] }
 0x233   :  { %2237 = vmatprep.subr.bf16.mxu1 %v2809_v52  ;;  %2205 = vmatprep.subr.bf16.mxu0 %v3084_v14  ;;  %v773_v52 = vld [vmem:[%s3637_s1 + $0x120] sm:$0xff] }
 0x234   :  { %v978_v17 = vld [vmem:[%s3637_s1] sm:$0xff] }
 0x235   :  { %v982_v25 = vld [vmem:[%s3637_s1 + $0x20] sm:$0xff] }
 0x236   :  { %2239 = vmatpush1.bf16.msra.mxu1 %v2839_v62  ;;  %2207 = vmatpush1.bf16.msra.mxu0 %v3092_v26  ;;  %v3110_v62 = vpack.c.bf16 %v773_v52, %v769_v48  ;;  %v3211_v37 = vpack.c.bf16 %v982_v25, %v978_v17  ;;  %v980_v48 = vld [vmem:[%s3637_s1 + $0x10] sm:$0xff]  ;;  %v3364_v25 = vpack.c.bf16 %v1033_v9, %v1029_v12 }
 0x237   :  { %2241 = vmatprep.subr.bf16.mxu1 %v2845_v0  ;;  %2209 = vmatprep.subr.bf16.mxu0 %v3102_v45  ;;  %v778_v0 = vld [vmem:[%s3637_s1 + $0x148] sm:$0xff]  ;;  %v984_v52 = vld [vmem:[%s3637_s1 + $0x30] sm:$0xff] }
 0x238   :  { %v1028_v17 = vld [vmem:[%s3637_s1 + $0x190] sm:$0xff] }
 0x23a   :  { %2243 = vmatpush1.bf16.msra.mxu1 %v2875_v15  ;;  %2211 = vmatpush1.bf16.msra.mxu0 %v3110_v62  ;;  %v782_v15 = vld [vmem:[%s3637_s1 + $0x168] sm:$0xff] }
 0x23b   :  { %2245 = vmatprep.subr.bf16.mxu1 %v2881_v18  ;;  %v3120_v18 = vpack.c.bf16 %v782_v15, %v778_v0  ;;  %v3220_v0 = vpack.c.bf16 %v984_v52, %v980_v48  ;;  %v987_v15 = vld [vmem:[%s3637_s1 + $0x48] sm:$0xff]  ;;  %v1032_v48 = vld [vmem:[%s3637_s1 + $0x1b0] sm:$0xff]  ;;  %v1037_v52 = vld [vmem:[%s3637_s1 + $0x1d8] sm:$0xff] }
 0x23d   :  { %2213 = vmatprep.subr.bf16.mxu0 %v3120_v18 }
 0x23e   :  { %2247 = vmatpush1.bf16.msra.mxu1 %v2908_v31  ;;  %v777_v31 = vld [vmem:[%s3637_s1 + $0x140] sm:$0xff] }
 0x23f   :  { %2249 = vmatprep.subr.bf16.mxu1 %v2911_v32  ;;  %v781_v32 = vld [vmem:[%s3637_s1 + $0x160] sm:$0xff] }
 0x242   :  { %2251 = vmatpush1.bf16.msra.mxu1 %v2930_v40  ;;  %v3128_v40 = vpack.c.bf16 %v781_v32, %v777_v31  ;;  %v991_v31 = vld [vmem:[%s3637_s1 + $0x68] sm:$0xff]  ;;  %v989_v32 = vld [vmem:[%s3637_s1 + $0x58] sm:$0xff] }
 0x243   :  { %2253 = vmatprep.subr.bf16.mxu1 %v2933_v41  ;;  %v786_v41 = vld [vmem:[%s3637_s1 + $0x188] sm:$0xff] }
 0x244   :  { %2215 = vmatpush1.bf16.msra.mxu0 %v3128_v40 }
 0x246   :  { %2255 = vmatpush1.bf16.msra.mxu1 %v2943_v47  ;;  %v790_v47 = vld [vmem:[%s3637_s1 + $0x1a8] sm:$0xff] }
 0x247   :  { %v3140_v16 = vpack.c.bf16 %v790_v47, %v786_v41  ;;  %2289 = vmatprep.subr.bf16.mxu1 %v3209_v33  ;;  %v3234_v41 = vpack.c.bf16 %v991_v31, %v987_v15  ;;  %v993_v47 = vld [vmem:[%s3637_s1 + $0x78] sm:$0xff]  ;;  %v3378_v31 = vpack.c.bf16 %v1032_v48, %v1028_v17 }
 0x248   :  { %v3245_v20 = vpack.c.bf16 %v993_v47, %v989_v32  ;;  %v1041_v15 = vld [vmem:[%s3637_s1 + $0x1f8] sm:$0xff]  ;;  %v1036_v47 = vld [vmem:[%s3637_s1 + $0x1d0] sm:$0xff] }
 0x249   :  { %2217 = vmatprep.subr.bf16.mxu0 %v3140_v16  ;;  %v3381_v32 = vpack.c.bf16 %v1041_v15, %v1037_v52  ;;  %v3392_v19 = vpack.c.bf16 %v1040_v13, %v1036_v47 }
 0x24a   :  { %2219 = vmatpush1.bf16.msra.mxu0 %v3152_v23 }
 0x24b   :  { %2221 = vmatprep.subr.bf16.mxu0 %v3155_v28 }
 0x24e   :  { %2223 = vmatpush1.bf16.msra.mxu0 %v3164_v35 }
 0x2fc   :  { %v626_v43 = vpop.f32.mrb[4].mxu0  ;;  %v697_v30 = vpop.f32.mrb[4].mxu1 }
 0x2fd   :  { %v702_v42 = vadd.f32 %v1952_v36, %v626_v43  ;;  %v628_v46 = vpop.f32.mrb[5].mxu0  ;;  %v699_v55 = vpop.f32.mrb[5].mxu1  ;;  %v704_v27 = vadd.f32 %v1954_v24, %v697_v30  ;;  %v3256_v36 = vpack.c.bf16 %v992_v34, %v988_v29  ;;  %v999_v43 = vld [vmem:[%s3637_s1 + $0xa8] sm:$0xff]  ;;  %v997_v30 = vld [vmem:[%s3637_s1 + $0x98] sm:$0xff]  ;;  %v996_v24 = vld [vmem:[%s3637_s1 + $0x90] sm:$0xff] }
 0x2fe   :  { %v703_v58 = vadd.f32 %v1953_v38, %v628_v46  ;;  %v705_v4 = vadd.f32 %v1955_v39, %v699_v55  ;;  %v995_v38 = vld [vmem:[%s3637_s1 + $0x88] sm:$0xff]  ;;  %v1001_v46 = vld [vmem:[%s3637_s1 + $0xb8] sm:$0xff]  ;;  %v994_v55 = vld [vmem:[%s3637_s1 + $0x80] sm:$0xff] }
 0x2ff   :  { %v1956_v7 = vmul.f32 -1.442695, %v702_v42  ;;  %v1958_v22 = vmul.f32 -1.442695, %v704_v27  ;;  %v3270_v42 = vpack.c.bf16 %v999_v43, %v995_v38  ;;  %v1000_v27 = vld [vmem:[%s3637_s1 + $0xb0] sm:$0xff]  ;;  %v1960_v29 = vld [vmem:[%s3638_s0 + $0x60] sm:$0xff] }
 0x300   :  { %v1957_v10 = vmul.f32 -1.442695, %v703_v58  ;;  %v998_v58 = vld [vmem:[%s3637_s1 + $0xa0] sm:$0xff]  ;;  %v3292_v39 = vpack.c.bf16 %v1000_v27, %v996_v24  ;;  %v1961_v34 = vld [vmem:[%s3638_s0 + $0x68] sm:$0xff] }
 0x301   :  { %2545 = vpow2.f32 %v1956_v7  ;;  %v3281_v7 = vpack.c.bf16 %v1001_v46, %v997_v30 }
 0x302   :  { %2547 = vpow2.f32 %v1957_v10  ;;  %v3283_v10 = vpack.c.bf16 %v998_v58, %v994_v55 }
 0x303   :  { %2549 = vtanh.f32 %v705_v4  ;;  %v1005_v4 = vld [vmem:[%s3637_s1 + $0xd8] sm:$0xff] }
 0x304   :  { %2551 = vpow2.f32 %v1958_v22  ;;  %v1009_v22 = vld [vmem:[%s3637_s1 + $0xf8] sm:$0xff] }
 0x30b   :  { %v2546_v44 = vpop.eup %2545 }
 0x30c   :  { %v715_v49 = vadd.f32 1.0, %v2546_v44  ;;  %v2548_v50 = vpop.eup %2547  ;;  %v3304_v44 = vpack.c.bf16 %v1009_v22, %v1005_v4  ;;  %v1962_v4 = vld [vmem:[%s3638_s0 + $0x70] sm:$0xff] }
 0x30d   :  { %v716_v51 = vadd.f32 1.0, %v2548_v50  ;;  %v2550_v53 = vpop.eup %2549  ;;  %v1008_v50 = vld [vmem:[%s3637_s1 + $0xf0] sm:$0xff] }
 0x30e   :  { %2553 = vrcp.f32 %v715_v49  ;;  %v2552_v54 = vpop.eup %2551  ;;  %v1004_v49 = vld [vmem:[%s3637_s1 + $0xd0] sm:$0xff] }
 0x30f   :  { %2555 = vrcp.f32 %v716_v51  ;;  %v717_v60 = vadd.f32 1.0, %v2552_v54  ;;  %v3312_v51 = vpack.c.bf16 %v1008_v50, %v1004_v49  ;;  %v1017_v54 = vld [vmem:[%s3637_s1 + $0x138] sm:$0xff] }
 0x310   :  { %v1963_v49 = vld [vmem:[%s3638_s0 + $0x78] sm:$0xff] }
 0x311   :  { %2557 = vrcp.f32 %v717_v60 }
 0x318   :  { %v2554_v56 = vpop.eup %2553 }
 0x319   :  { %v726_v57 = vmul.f32 %v2554_v56, %v2550_v53  ;;  %v2556_v59 = vpop.eup %2555  ;;  %v1013_v53 = vld [vmem:[%s3637_s1 + $0x118] sm:$0xff] }
 0x31a   :  { %v725_v61 = vmul.f32 %v2556_v59, %v3050_v5  ;;  %v979_v5 = vld [vmem:[%s3637_s1 + $0x8] sm:$0xff]  ;;  %v3324_v56 = vpack.c.bf16 %v1017_v54, %v1013_v53  ;;  %v1016_v59 = vld [vmem:[%s3637_s1 + $0x130] sm:$0xff] }
 0x31b   :  { %v2558_v1 = vpop.eup %2557  ;;  %v3198_v8 = vpack.c.bf16 %v983_v11, %v979_v5  ;;  %v1024_v5 = vld [vmem:[%s3637_s1 + $0x170] sm:$0xff] }
 0x31c   :  { %v3181_v63 = vadd.f32 %v726_v57, %v725_v61  ;;  %v1012_v57 = vld [vmem:[%s3637_s1 + $0x110] sm:$0xff]  ;;  %v1021_v61 = vld [vmem:[%s3637_s1 + $0x158] sm:$0xff] }
 0x31d   :  { %2257 = vmatprep.subr.bf16.mxu0 %v3198_v8  ;;  %v3332_v60 = vpack.c.bf16 %v1016_v59, %v1012_v57 }
 0x31e   :  { %2559 = vtanh.f32 %v3181_v63 }
 0x328   :  { %v2560_v2 = vpop.eup %2559 }
 0x329   :  { %v729_v6 = vmul.f32 %v2560_v2, %v2558_v1  ;;  %v1025_v1 = vld [vmem:[%s3637_s1 + $0x178] sm:$0xff] }
 0x32a   :  { %v3344_v2 = vpack.c.bf16 %v1025_v1, %v1021_v61 }
 0x32b   :  { %1959 = vst [vmem:[%s3639_s2 + $0x10] sm:$0xff] %v729_v6  ;;  %866 = vmatmul.mubr.f32.vlgmr.msra.gmra.mrb[6].mxu0 %v729_v6  ;;  %937 = vmatmul.mubr.f32.vlgmr.msra.gmra.mrb[6].mxu1 %v729_v6  ;;  %v1020_v6 = vld [vmem:[%s3637_s1 + $0x150] sm:$0xff] }
 0x32c   :  { %1106 = vmatprep.mubr.f32.mxu0 %v2641_v3  ;;  %1177 = vmatprep.mubr.f32.mxu1 %v2641_v3  ;;  %v3352_v11 = vpack.c.bf16 %v1024_v5, %v1020_v6 }
 0x32d   :  { %2259 = vmatpush1.bf16.msra.mxu0 %v3211_v37  ;;  %2291 = vmatpush1.bf16.msra.mxu1 %v3220_v0 }
 0x32e   :  { %2261 = vmatprep.subr.bf16.mxu0 %v3234_v41  ;;  %2293 = vmatprep.subr.bf16.mxu1 %v3245_v20 }
 0x331   :  { %2263 = vmatpush1.bf16.msra.mxu0 %v3247_v21  ;;  %2295 = vmatpush1.bf16.msra.mxu1 %v3256_v36 }
 0x332   :  { %2265 = vmatprep.subr.bf16.mxu0 %v3270_v42  ;;  %2297 = vmatprep.subr.bf16.mxu1 %v3281_v7 }
 0x335   :  { %2267 = vmatpush1.bf16.msra.mxu0 %v3283_v10  ;;  %2299 = vmatpush1.bf16.msra.mxu1 %v3292_v39 }
 0x336   :  { %2269 = vmatprep.subr.bf16.mxu0 %v3084_v14  ;;  %2301 = vmatprep.subr.bf16.mxu1 %v3304_v44 }
 0x339   :  { %2271 = vmatpush1.bf16.msra.mxu0 %v3092_v26  ;;  %2303 = vmatpush1.bf16.msra.mxu1 %v3312_v51 }
 0x33a   :  { %2273 = vmatprep.subr.bf16.mxu0 %v3102_v45  ;;  %2305 = vmatprep.subr.bf16.mxu1 %v3324_v56 }
 0x33d   :  { %2275 = vmatpush1.bf16.msra.mxu0 %v3110_v62  ;;  %2307 = vmatpush1.bf16.msra.mxu1 %v3332_v60 }
 0x33e   :  { %2277 = vmatprep.subr.bf16.mxu0 %v3120_v18  ;;  %2309 = vmatprep.subr.bf16.mxu1 %v3344_v2 }
 0x341   :  { %2279 = vmatpush1.bf16.msra.mxu0 %v3128_v40  ;;  %2311 = vmatpush1.bf16.msra.mxu1 %v3352_v11 }
 0x342   :  { %2281 = vmatprep.subr.bf16.mxu0 %v3140_v16  ;;  %2313 = vmatprep.subr.bf16.mxu1 %v3364_v25 }
 0x345   :  { %2283 = vmatpush1.bf16.msra.mxu0 %v3152_v23  ;;  %2315 = vmatpush1.bf16.msra.mxu1 %v3378_v31 }
 0x346   :  { %2285 = vmatprep.subr.bf16.mxu0 %v3155_v28  ;;  %2317 = vmatprep.subr.bf16.mxu1 %v3381_v32 }
 0x349   :  { %2287 = vmatpush1.bf16.msra.mxu0 %v3164_v35  ;;  %2319 = vmatpush1.bf16.msra.mxu1 %v3392_v19 }
 0x34a   :  { %2321 = vmatprep.subr.bf16.mxu0 %v3198_v8  ;;  %2353 = vmatprep.subr.bf16.mxu1 %v3209_v33 }
 0x3fe   :  { %v867_v38 = vpop.f32.mrb[6].mxu0  ;;  %v938_v43 = vpop.f32.mrb[6].mxu1 }
 0x3ff   :  { %v943_v30 = vadd.f32 %v1960_v29, %v867_v38  ;;  %v869_v46 = vpop.f32.mrb[7].mxu0  ;;  %v940_v55 = vpop.f32.mrb[7].mxu1  ;;  %v945_v22 = vadd.f32 %v1962_v4, %v938_v43  ;;  %v1969_v29 = vld [vmem:[%s3638_s0 + $0x88] sm:$0xff] }
 0x400   :  { %v944_v58 = vadd.f32 %v1961_v34, %v869_v46  ;;  %v946_v50 = vadd.f32 %v1963_v49, %v940_v55 }
 0x401   :  { %v1964_v24 = vmul.f32 -1.442695, %v943_v30  ;;  %v1966_v53 = vmul.f32 -1.442695, %v945_v22  ;;  %v1971_v22 = vld [vmem:[%s3638_s0 + $0x98] sm:$0xff] }
 0x402   :  { %v1965_v27 = vmul.f32 -1.442695, %v944_v58 }
 0x403   :  { %2561 = vpow2.f32 %v1964_v24 }
 0x404   :  { %2563 = vpow2.f32 %v1965_v27  ;;  %v1970_v27 = vld [vmem:[%s3638_s0 + $0x90] sm:$0xff] }
 0x405   :  { %2565 = vtanh.f32 %v946_v50 }
 0x406   :  { %2567 = vpow2.f32 %v1966_v53 }
 0x40d   :  { %v2562_v54 = vpop.eup %2561 }
 0x40e   :  { %v956_v57 = vadd.f32 1.0, %v2562_v54  ;;  %v2564_v59 = vpop.eup %2563 }
 0x40f   :  { %v957_v61 = vadd.f32 1.0, %v2564_v59  ;;  %v2566_v1 = vpop.eup %2565 }
 0x410   :  { %2569 = vrcp.f32 %v956_v57  ;;  %v2568_v6 = vpop.eup %2567 }
 0x411   :  { %2571 = vrcp.f32 %v957_v61  ;;  %v958_v17 = vadd.f32 1.0, %v2568_v6 }
 0x413   :  { %2573 = vrcp.f32 %v958_v17 }
 0x41a   :  { %v2570_v5 = vpop.eup %2569 }
 0x41b   :  { %v967_v12 = vmul.f32 %v2570_v5, %v2566_v1  ;;  %v2572_v9 = vpop.eup %2571 }
 0x41c   :  { %v966_v48 = vmul.f32 %v2572_v9, %v3181_v63  ;;  %v1968_v63 = vld [vmem:[%s3638_s0 + $0x80] sm:$0xff] }
 0x41d   :  { %v2574_v15 = vpop.eup %2573 }
 0x41e   :  { %v3412_v52 = vadd.f32 %v967_v12, %v966_v48 }
 0x420   :  { %2575 = vtanh.f32 %v3412_v52 }
 0x42a   :  { %v2576_v47 = vpop.eup %2575 }
 0x42b   :  { %v970_v13 = vmul.f32 %v2576_v47, %v2574_v15 }
 0x42d   :  { %1967 = vst [vmem:[%s3639_s2 + $0x18] sm:$0xff] %v970_v13  ;;  %1107 = vmatmul.mubr.f32.vlgmr.msra.gmra.mrb[8].mxu0 %v970_v13  ;;  %1178 = vmatmul.mubr.f32.vlgmr.msra.gmra.mrb[8].mxu1 %v970_v13 }
 0x42e   :  { %2323 = vmatpush1.bf16.msra.mxu0 %v3211_v37  ;;  %2355 = vmatpush1.bf16.msra.mxu1 %v3220_v0 }
 0x42f   :  { %2325 = vmatprep.subr.bf16.mxu0 %v3234_v41  ;;  %2357 = vmatprep.subr.bf16.mxu1 %v3245_v20 }
 0x430   :  { %1347 = vmatprep.mubr.f32.mxu0 %v2641_v3  ;;  %1418 = vmatprep.mubr.f32.mxu1 %v2641_v3 }
 0x432   :  { %2327 = vmatpush1.bf16.msra.mxu0 %v3247_v21  ;;  %2359 = vmatpush1.bf16.msra.mxu1 %v3256_v36 }
 0x433   :  { %2329 = vmatprep.subr.bf16.mxu0 %v3270_v42  ;;  %2361 = vmatprep.subr.bf16.mxu1 %v3281_v7 }
 0x436   :  { %2331 = vmatpush1.bf16.msra.mxu0 %v3283_v10  ;;  %2363 = vmatpush1.bf16.msra.mxu1 %v3292_v39 }
 0x437   :  { %2333 = vmatprep.subr.bf16.mxu0 %v3084_v14  ;;  %2365 = vmatprep.subr.bf16.mxu1 %v3304_v44 }
 0x43a   :  { %2335 = vmatpush1.bf16.msra.mxu0 %v3092_v26  ;;  %2367 = vmatpush1.bf16.msra.mxu1 %v3312_v51 }
 0x43b   :  { %2337 = vmatprep.subr.bf16.mxu0 %v3102_v45  ;;  %2369 = vmatprep.subr.bf16.mxu1 %v3324_v56 }
 0x43e   :  { %2339 = vmatpush1.bf16.msra.mxu0 %v3110_v62  ;;  %2371 = vmatpush1.bf16.msra.mxu1 %v3332_v60 }
 0x43f   :  { %2341 = vmatprep.subr.bf16.mxu0 %v3120_v18  ;;  %2373 = vmatprep.subr.bf16.mxu1 %v3344_v2 }
 0x442   :  { %2343 = vmatpush1.bf16.msra.mxu0 %v3128_v40  ;;  %2375 = vmatpush1.bf16.msra.mxu1 %v3352_v11 }
 0x443   :  { %2345 = vmatprep.subr.bf16.mxu0 %v3140_v16  ;;  %2377 = vmatprep.subr.bf16.mxu1 %v3364_v25 }
 0x446   :  { %2347 = vmatpush1.bf16.msra.mxu0 %v3152_v23  ;;  %2379 = vmatpush1.bf16.msra.mxu1 %v3378_v31 }
 0x447   :  { %2349 = vmatprep.subr.bf16.mxu0 %v3155_v28  ;;  %2381 = vmatprep.subr.bf16.mxu1 %v3381_v32 }
 0x44a   :  { %2351 = vmatpush1.bf16.msra.mxu0 %v3164_v35  ;;  %2383 = vmatpush1.bf16.msra.mxu1 %v3392_v19 }
 0x44b   :  { %2385 = vmatprep.subr.bf16.mxu0 %v3198_v8  ;;  %2417 = vmatprep.subr.bf16.mxu1 %v3209_v33 }
 0x500   :  { %v1108_v34 = vpop.f32.mrb[8].mxu0  ;;  %v1179_v38 = vpop.f32.mrb[8].mxu1 }
 0x501   :  { %v1184_v43 = vadd.f32 %v1968_v63, %v1108_v34  ;;  %v1110_v30 = vpop.f32.mrb[9].mxu0  ;;  %v1181_v46 = vpop.f32.mrb[9].mxu1  ;;  %v1186_v4 = vadd.f32 %v1970_v27, %v1179_v38 }
 0x502   :  { %v1185_v55 = vadd.f32 %v1969_v29, %v1110_v30  ;;  %v1187_v49 = vadd.f32 %v1971_v22, %v1181_v46 }
 0x503   :  { %v1972_v58 = vmul.f32 -1.442695, %v1184_v43  ;;  %v1974_v50 = vmul.f32 -1.442695, %v1186_v4 }
 0x504   :  { %v1973_v24 = vmul.f32 -1.442695, %v1185_v55 }
 0x505   :  { %2577 = vpow2.f32 %v1972_v58 }
 0x506   :  { %2579 = vpow2.f32 %v1973_v24 }
 0x507   :  { %2581 = vtanh.f32 %v1187_v49 }
 0x508   :  { %2583 = vpow2.f32 %v1974_v50 }
 0x50f   :  { %v2578_v53 = vpop.eup %2577 }
 0x510   :  { %v1197_v54 = vadd.f32 1.0, %v2578_v53  ;;  %v2580_v57 = vpop.eup %2579 }
 0x511   :  { %v1198_v59 = vadd.f32 1.0, %v2580_v57  ;;  %v2582_v61 = vpop.eup %2581 }
 0x512   :  { %2585 = vrcp.f32 %v1197_v54  ;;  %v2584_v1 = vpop.eup %2583 }
 0x513   :  { %2587 = vrcp.f32 %v1198_v59  ;;  %v1199_v9 = vadd.f32 1.0, %v2584_v1  ;;  %v1753_v59 = vld [vmem:[%s3637_s1 + $0x1a0] sm:$0xff]  ;;  %v1762_v1 = vld [vmem:[%s3637_s1 + $0x1e8] sm:$0xff] }
 0x515   :  { %2589 = vrcp.f32 %v1199_v9  ;;  %v1761_v9 = vld [vmem:[%s3637_s1 + $0x1e0] sm:$0xff] }
 0x51c   :  { %v2586_v6 = vpop.eup %2585 }
 0x51d   :  { %v1208_v5 = vmul.f32 %v2586_v6, %v2582_v61  ;;  %v2588_v12 = vpop.eup %2587  ;;  %v1758_v61 = vld [vmem:[%s3637_s1 + $0x1c8] sm:$0xff] }
 0x51e   :  { %v1207_v17 = vmul.f32 %v2588_v12, %v3412_v52  ;;  %v1979_v52 = vld [vmem:[%s3638_s0 + $0xb8] sm:$0xff]  ;;  %v1757_v12 = vld [vmem:[%s3637_s1 + $0x1c0] sm:$0xff] }
 0x51f   :  { %v2590_v15 = vpop.eup %2589 }
 0x520   :  { %v3465_v48 = vadd.f32 %v1208_v5, %v1207_v17  ;;  %v2476_v5 = vpack.c.bf16 %v1762_v1, %v1758_v61  ;;  %v2478_v17 = vpack.c.bf16 %v1761_v9, %v1757_v12 }
 0x522   :  { %2591 = vtanh.f32 %v3465_v48 }
 0x52c   :  { %v2592_v47 = vpop.eup %2591 }
 0x52d   :  { %v1211_v13 = vmul.f32 %v2592_v47, %v2590_v15  ;;  %v1985_v15 = vld [vmem:[%s3638_s0 + $0xc8] sm:$0xff] }
 0x52f   :  { %1975 = vst [vmem:[%s3639_s2 + $0x20] sm:$0xff] %v1211_v13  ;;  %1348 = vmatmul.mubr.f32.vlgmr.msra.gmra.mrb[10].mxu0 %v1211_v13  ;;  %1419 = vmatmul.mubr.f32.vlgmr.msra.gmra.mrb[10].mxu1 %v1211_v13 }
 0x530   :  { %2387 = vmatpush1.bf16.msra.mxu0 %v3211_v37  ;;  %2419 = vmatpush1.bf16.msra.mxu1 %v3220_v0 }
 0x531   :  { %2389 = vmatprep.subr.bf16.mxu0 %v3234_v41  ;;  %2421 = vmatprep.subr.bf16.mxu1 %v3245_v20 }
 0x532   :  { %1588 = vmatprep.mubr.f32.mxu0 %v2641_v3  ;;  %1659 = vmatprep.mubr.f32.mxu1 %v2641_v3 }
 0x534   :  { %2391 = vmatpush1.bf16.msra.mxu0 %v3247_v21  ;;  %2423 = vmatpush1.bf16.msra.mxu1 %v3256_v36 }
 0x535   :  { %2393 = vmatprep.subr.bf16.mxu0 %v3270_v42  ;;  %2425 = vmatprep.subr.bf16.mxu1 %v3281_v7 }
 0x538   :  { %2395 = vmatpush1.bf16.msra.mxu0 %v3283_v10  ;;  %2427 = vmatpush1.bf16.msra.mxu1 %v3292_v39 }
 0x539   :  { %2397 = vmatprep.subr.bf16.mxu0 %v3084_v14  ;;  %2429 = vmatprep.subr.bf16.mxu1 %v3304_v44  ;;  %v1976_v14 = vld [vmem:[%s3638_s0 + $0xa0] sm:$0xff] }
 0x53c   :  { %2399 = vmatpush1.bf16.msra.mxu0 %v3092_v26  ;;  %2431 = vmatpush1.bf16.msra.mxu1 %v3312_v51  ;;  %v1977_v26 = vld [vmem:[%s3638_s0 + $0xa8] sm:$0xff] }
 0x53d   :  { %2401 = vmatprep.subr.bf16.mxu0 %v3102_v45  ;;  %2433 = vmatprep.subr.bf16.mxu1 %v3324_v56 }
 0x540   :  { %2403 = vmatpush1.bf16.msra.mxu0 %v3110_v62  ;;  %2435 = vmatpush1.bf16.msra.mxu1 %v3332_v60 }
 0x541   :  { %2405 = vmatprep.subr.bf16.mxu0 %v3120_v18  ;;  %2437 = vmatprep.subr.bf16.mxu1 %v3344_v2 }
 0x544   :  { %2407 = vmatpush1.bf16.msra.mxu0 %v3128_v40  ;;  %2439 = vmatpush1.bf16.msra.mxu1 %v3352_v11 }
 0x545   :  { %2409 = vmatprep.subr.bf16.mxu0 %v3140_v16  ;;  %2441 = vmatprep.subr.bf16.mxu1 %v3364_v25 }
 0x548   :  { %2411 = vmatpush1.bf16.msra.mxu0 %v3152_v23  ;;  %2443 = vmatpush1.bf16.msra.mxu1 %v3378_v31 }
 0x549   :  { %2413 = vmatprep.subr.bf16.mxu0 %v3155_v28  ;;  %2445 = vmatprep.subr.bf16.mxu1 %v3381_v32 }
 0x54c   :  { %2415 = vmatpush1.bf16.msra.mxu0 %v3164_v35  ;;  %2447 = vmatpush1.bf16.msra.mxu1 %v3392_v19 }
 0x54d   :  { %2449 = vmatprep.subr.bf16.mxu0 %v3198_v8  ;;  %2481 = vmatprep.subr.bf16.mxu1 %v3209_v33  ;;  %v1978_v8 = vld [vmem:[%s3638_s0 + $0xb0] sm:$0xff] }
 0x602   :  { %v1349_v45 = vpop.f32.mrb[10].mxu0  ;;  %v1420_v62 = vpop.f32.mrb[10].mxu1 }
 0x603   :  { %v1425_v18 = vadd.f32 %v1976_v14, %v1349_v45  ;;  %v1351_v40 = vpop.f32.mrb[11].mxu0  ;;  %v1422_v16 = vpop.f32.mrb[11].mxu1  ;;  %v1427_v33 = vadd.f32 %v1978_v8, %v1420_v62 }
 0x604   :  { %v1426_v23 = vadd.f32 %v1977_v26, %v1351_v40  ;;  %v1428_v63 = vadd.f32 %v1979_v52, %v1422_v16  ;;  %v1986_v16 = vld [vmem:[%s3638_s0 + $0xd0] sm:$0xff] }
 0x605   :  { %v1980_v28 = vmul.f32 -1.442695, %v1425_v18  ;;  %v1982_v29 = vmul.f32 -1.442695, %v1427_v33 }
 0x606   :  { %v1981_v35 = vmul.f32 -1.442695, %v1426_v23 }
 0x607   :  { %2593 = vpow2.f32 %v1980_v28  ;;  %v1987_v28 = vld [vmem:[%s3638_s0 + $0xd8] sm:$0xff] }
 0x608   :  { %2595 = vpow2.f32 %v1981_v35 }
 0x609   :  { %2597 = vtanh.f32 %v1428_v63 }
 0x60a   :  { %2599 = vpow2.f32 %v1982_v29 }
 0x611   :  { %v2594_v34 = vpop.eup %2593 }
 0x612   :  { %v1438_v38 = vadd.f32 1.0, %v2594_v34  ;;  %v2596_v43 = vpop.eup %2595 }
 0x613   :  { %v1439_v30 = vadd.f32 1.0, %v2596_v43  ;;  %v2598_v46 = vpop.eup %2597 }
 0x614   :  { %2601 = vrcp.f32 %v1438_v38  ;;  %v2600_v55 = vpop.eup %2599 }
 0x615   :  { %2603 = vrcp.f32 %v1439_v30  ;;  %v1440_v4 = vadd.f32 1.0, %v2600_v55 }
 0x617   :  { %2605 = vrcp.f32 %v1440_v4 }
 0x61e   :  { %v2602_v58 = vpop.eup %2601 }
 0x61f   :  { %v1449_v24 = vmul.f32 %v2602_v58, %v2598_v46  ;;  %v2604_v27 = vpop.eup %2603 }
 0x620   :  { %v1448_v22 = vmul.f32 %v2604_v27, %v3465_v48  ;;  %v1984_v48 = vld [vmem:[%s3638_s0 + $0xc0] sm:$0xff] }
 0x621   :  { %v2606_v50 = vpop.eup %2605 }
 0x622   :  { %v3518_v49 = vadd.f32 %v1449_v24, %v1448_v22 }
 0x624   :  { %2607 = vtanh.f32 %v3518_v49 }
 0x62e   :  { %v2608_v53 = vpop.eup %2607 }
 0x62f   :  { %v1452_v54 = vmul.f32 %v2608_v53, %v2606_v50  ;;  %v1992_v50 = vld [vmem:[%s3638_s0 + $0xe0] sm:$0xff] }
 0x631   :  { %1983 = vst [vmem:[%s3639_s2 + $0x28] sm:$0xff] %v1452_v54  ;;  %1589 = vmatmul.mubr.f32.vlgmr.msra.gmra.mrb[12].mxu0 %v1452_v54  ;;  %1660 = vmatmul.mubr.f32.vlgmr.msra.gmra.mrb[12].mxu1 %v1452_v54 }
 0x632   :  { %2451 = vmatpush1.bf16.msra.mxu0 %v3211_v37  ;;  %2483 = vmatpush1.bf16.msra.mxu1 %v3220_v0  ;;  %v1730_v37 = vld [vmem:[%s3637_s1 + $0xe8] sm:$0xff] }
 0x633   :  { %2453 = vmatprep.subr.bf16.mxu0 %v3234_v41  ;;  %2485 = vmatprep.subr.bf16.mxu1 %v3245_v20  ;;  %v1725_v41 = vld [vmem:[%s3637_s1 + $0xc0] sm:$0xff] }
 0x634   :  { %1829 = vmatprep.mubr.f32.mxu0 %v2641_v3  ;;  %1900 = vmatprep.mubr.f32.mxu1 %v2641_v3  ;;  %v1726_v3 = vld [vmem:[%s3637_s1 + $0xc8] sm:$0xff]  ;;  %v1729_v20 = vld [vmem:[%s3637_s1 + $0xe0] sm:$0xff] }
 0x635   :  { %v2460_v0 = vpack.c.bf16 %v1730_v37, %v1726_v3 }
 0x636   :  { %2455 = vmatpush1.bf16.msra.mxu0 %v3247_v21  ;;  %2487 = vmatpush1.bf16.msra.mxu1 %v3256_v36  ;;  %v2462_v21 = vpack.c.bf16 %v1729_v20, %v1725_v41  ;;  %v1734_v36 = vld [vmem:[%s3637_s1 + $0x108] sm:$0xff] }
 0x637   :  { %2457 = vmatprep.subr.bf16.mxu0 %v3270_v42  ;;  %2489 = vmatprep.subr.bf16.mxu1 %v3281_v7  ;;  %v1738_v42 = vld [vmem:[%s3637_s1 + $0x128] sm:$0xff] }
 0x638   :  { %v2464_v7 = vpack.c.bf16 %v1738_v42, %v1734_v36  ;;  %v1994_v36 = vld [vmem:[%s3638_s0 + $0xf0] sm:$0xff] }
 0x63a   :  { %2459 = vmatpush1.bf16.msra.mxu0 %v3283_v10  ;;  %2491 = vmatpush1.bf16.msra.mxu1 %v3292_v39  ;;  %v1733_v10 = vld [vmem:[%s3637_s1 + $0x100] sm:$0xff] }
 0x63b   :  { %2493 = vmatprep.subr.bf16.mxu1 %v3304_v44  ;;  %2461 = vmatprep.subr.bf16.mxu0 %v2460_v0  ;;  %v1737_v39 = vld [vmem:[%s3637_s1 + $0x120] sm:$0xff] }
 0x63c   :  { %v2466_v44 = vpack.c.bf16 %v1737_v39, %v1733_v10 }
 0x63e   :  { %2495 = vmatpush1.bf16.msra.mxu1 %v3312_v51  ;;  %2463 = vmatpush1.bf16.msra.mxu0 %v2462_v21  ;;  %v1742_v51 = vld [vmem:[%s3637_s1 + $0x148] sm:$0xff] }
 0x63f   :  { %2497 = vmatprep.subr.bf16.mxu1 %v3324_v56  ;;  %2465 = vmatprep.subr.bf16.mxu0 %v2464_v7  ;;  %v1746_v56 = vld [vmem:[%s3637_s1 + $0x168] sm:$0xff]  ;;  %v1995_v7 = vld [vmem:[%s3638_s0 + $0xf8] sm:$0xff] }
 0x642   :  { %2499 = vmatpush1.bf16.msra.mxu1 %v3332_v60  ;;  %2467 = vmatpush1.bf16.msra.mxu0 %v2466_v44  ;;  %v2468_v60 = vpack.c.bf16 %v1746_v56, %v1742_v51 }
 0x643   :  { %2501 = vmatprep.subr.bf16.mxu1 %v3344_v2  ;;  %v1741_v2 = vld [vmem:[%s3637_s1 + $0x140] sm:$0xff] }
 0x644   :  { %2469 = vmatprep.subr.bf16.mxu0 %v2468_v60 }
 0x646   :  { %2503 = vmatpush1.bf16.msra.mxu1 %v3352_v11  ;;  %v1745_v11 = vld [vmem:[%s3637_s1 + $0x160] sm:$0xff] }
 0x647   :  { %2505 = vmatprep.subr.bf16.mxu1 %v3364_v25  ;;  %v2470_v25 = vpack.c.bf16 %v1745_v11, %v1741_v2 }
 0x649   :  { %2471 = vmatpush1.bf16.msra.mxu0 %v2470_v25 }
 0x64a   :  { %2507 = vmatpush1.bf16.msra.mxu1 %v3378_v31  ;;  %v1750_v31 = vld [vmem:[%s3637_s1 + $0x188] sm:$0xff] }
 0x64b   :  { %2509 = vmatprep.subr.bf16.mxu1 %v3381_v32  ;;  %v1754_v32 = vld [vmem:[%s3637_s1 + $0x1a8] sm:$0xff] }
 0x64c   :  { %v2472_v57 = vpack.c.bf16 %v1754_v32, %v1750_v31 }
 0x64e   :  { %2511 = vmatpush1.bf16.msra.mxu1 %v3392_v19  ;;  %v1749_v19 = vld [vmem:[%s3637_s1 + $0x180] sm:$0xff]  ;;  %2473 = vmatprep.subr.bf16.mxu0 %v2472_v57 }
 0x64f   :  { %v2474_v6 = vpack.c.bf16 %v1753_v59, %v1749_v19 }
 0x651   :  { %2475 = vmatpush1.bf16.msra.mxu0 %v2474_v6 }
 0x652   :  { %2477 = vmatprep.subr.bf16.mxu0 %v2476_v5 }
 0x655   :  { %2479 = vmatpush1.bf16.msra.mxu0 %v2478_v17 }
 0x704   :  { %v1590_v47 = vpop.f32.mrb[12].mxu0  ;;  %v1661_v13 = vpop.f32.mrb[12].mxu1 }
 0x705   :  { %v1666_v14 = vadd.f32 %v1984_v48, %v1590_v47  ;;  %v1592_v26 = vpop.f32.mrb[13].mxu0  ;;  %v1663_v45 = vpop.f32.mrb[13].mxu1  ;;  %v1668_v23 = vadd.f32 %v1986_v16, %v1661_v13 }
 0x706   :  { %v1667_v62 = vadd.f32 %v1985_v15, %v1592_v26  ;;  %v1669_v35 = vadd.f32 %v1987_v28, %v1663_v45 }
 0x707   :  { %v1988_v18 = vmul.f32 -1.442695, %v1666_v14  ;;  %v1990_v8 = vmul.f32 -1.442695, %v1668_v23 }
 0x708   :  { %v1989_v40 = vmul.f32 -1.442695, %v1667_v62 }
 0x709   :  { %2609 = vpow2.f32 %v1988_v18 }
 0x70a   :  { %2611 = vpow2.f32 %v1989_v40 }
 0x70b   :  { %2613 = vtanh.f32 %v1669_v35 }
 0x70c   :  { %2615 = vpow2.f32 %v1990_v8 }
 0x713   :  { %v2610_v33 = vpop.eup %2609 }
 0x714   :  { %v1679_v52 = vadd.f32 1.0, %v2610_v33  ;;  %v2612_v63 = vpop.eup %2611 }
 0x715   :  { %v1680_v29 = vadd.f32 1.0, %v2612_v63  ;;  %v2614_v34 = vpop.eup %2613 }
 0x716   :  { %2617 = vrcp.f32 %v1679_v52  ;;  %v2616_v38 = vpop.eup %2615 }
 0x717   :  { %2619 = vrcp.f32 %v1680_v29  ;;  %v1681_v55 = vadd.f32 1.0, %v2616_v38 }
 0x719   :  { %2621 = vrcp.f32 %v1681_v55 }
 0x720   :  { %v2618_v43 = vpop.eup %2617 }
 0x721   :  { %v1690_v30 = vmul.f32 %v2618_v43, %v2614_v34  ;;  %v2620_v46 = vpop.eup %2619 }
 0x722   :  { %v1689_v58 = vmul.f32 %v2620_v46, %v3518_v49  ;;  %v1993_v49 = vld [vmem:[%s3638_s0 + $0xe8] sm:$0xff] }
 0x723   :  { %v2622_v27 = vpop.eup %2621 }
 0x724   :  { %v1691_v24 = vadd.f32 %v1690_v30, %v1689_v58 }
 0x726   :  { %2623 = vtanh.f32 %v1691_v24 }
 0x730   :  { %v2624_v4 = vpop.eup %2623 }
 0x731   :  { %v1693_v22 = vmul.f32 %v2624_v4, %v2622_v27 }
 0x733   :  { %1991 = vst [vmem:[%s3639_s2 + $0x30] sm:$0xff] %v1693_v22  ;;  %1830 = vmatmul.mubr.f32.vlgmr.msra.gmra.mrb[14].mxu0 %v1693_v22  ;;  %1901 = vmatmul.mubr.f32.vlgmr.msra.gmra.mrb[14].mxu1 %v1693_v22 }
 0x806   :  { %v1831_v53 = vpop.f32.mrb[14].mxu0  ;;  %v1902_v54 = vpop.f32.mrb[14].mxu1 }
 0x807   :  { %v1907_v3 = vadd.f32 %v1992_v50, %v1831_v53  ;;  %v1833_v37 = vpop.f32.mrb[15].mxu0  ;;  %v1904_v0 = vpop.f32.mrb[15].mxu1  ;;  %v1909_v42 = vadd.f32 %v1994_v36, %v1902_v54 }
 0x808   :  { %v1908_v41 = vadd.f32 %v1993_v49, %v1833_v37  ;;  %v1910_v10 = vadd.f32 %v1995_v7, %v1904_v0 }
 0x809   :  { %v1996_v20 = vmul.f32 -1.442695, %v1907_v3  ;;  %v1998_v39 = vmul.f32 -1.442695, %v1909_v42 }
 0x80a   :  { %v1997_v21 = vmul.f32 -1.442695, %v1908_v41 }
 0x80b   :  { %2625 = vpow2.f32 %v1996_v20 }
 0x80c   :  { %2627 = vpow2.f32 %v1997_v21 }
 0x80d   :  { %2629 = vtanh.f32 %v1910_v10 }
 0x80e   :  { %2631 = vpow2.f32 %v1998_v39 }
 0x815   :  { %v2626_v44 = vpop.eup %2625 }
 0x816   :  { %v1920_v51 = vadd.f32 1.0, %v2626_v44  ;;  %v2628_v56 = vpop.eup %2627 }
 0x817   :  { %v1921_v60 = vadd.f32 1.0, %v2628_v56  ;;  %v2630_v2 = vpop.eup %2629 }
 0x818   :  { %2633 = vrcp.f32 %v1920_v51  ;;  %v2632_v11 = vpop.eup %2631 }
 0x819   :  { %2635 = vrcp.f32 %v1921_v60  ;;  %v1922_v19 = vadd.f32 1.0, %v2632_v11 }
 0x81b   :  { %2637 = vrcp.f32 %v1922_v19 }
 0x822   :  { %v2634_v25 = vpop.eup %2633 }
 0x823   :  { %v1931_v31 = vmul.f32 %v2634_v25, %v2630_v2  ;;  %v2636_v32 = vpop.eup %2635 }
 0x824   :  { %v1930_v57 = vmul.f32 %v2636_v32, %v1691_v24 }
 0x825   :  { %v2638_v61 = vpop.eup %2637 }
 0x826   :  { %v1932_v59 = vadd.f32 %v1931_v31, %v1930_v57 }
 0x828   :  { %2639 = vtanh.f32 %v1932_v59 }
 0x832   :  { %v2640_v1 = vpop.eup %2639 }
 0x833   :  { %v1934_v6 = vmul.f32 %v2640_v1, %v2638_v61 }
 0x835   :  { %1999 = vst [vmem:[%s3639_s2 + $0x38] sm:$0xff] %v1934_v6 }

</bundles_post_ra>
